<compile_context>
chip_gen: v5e
topology: v5e:2x2
jax: 0.10.0
libtpu: 0.0.40
codegen_flags: <defaults>
</compile_context>

<pallas_src>
import jax
import jax.numpy as jnp
from jax.experimental import pallas as pl
from jax.experimental.pallas import tpu as pltpu

# ----------------------------- small config -----------------------------
B = 2            # batch
INPUT_TDIM = 64  # time frames
INPUT_FDIM = 16  # frequency bins
PATCH = 16       # patch-embed conv kernel size
FSTRIDE = 16     # no-overlap strides
TSTRIDE = 16
EMBED_DIM = 64   # "original_embedding_dim" (768 in real deit-base), small here
HEADS = 4
HEAD_DIM = EMBED_DIM // HEADS
DEPTH = 2        # number of transformer blocks (12 in real deit-base)
MLP_HIDDEN = 4 * EMBED_DIM
LABEL_DIM = 10   # label_dim (527 for AudioSet)

F_DIM = (INPUT_FDIM - PATCH) // FSTRIDE + 1     # conv output height (freq) == 1
T_DIM = (INPUT_TDIM - PATCH) // TSTRIDE + 1     # conv output width  (time) == 4
NUM_PATCHES = F_DIM * T_DIM
SEQ = NUM_PATCHES + 2                           # + cls + dist (deit)
SEQ_PAD = ((SEQ + 7) // 8) * 8                  # sublane-aligned token count per batch elem
ROWS = B * SEQ_PAD                              # batch folded into sublanes
PATCH_ELEMS = PATCH * PATCH
HEAD_PAD = ((LABEL_DIM + 127) // 128) * 128     # lane-dense classifier output width

MM_DTYPE = jnp.bfloat16                         # MXU operand dtype (f32 accumulation)

# Kernel weight-argument order (after the per-batch patches input).
_WEIGHT_ORDER = (
    "attn_bias", "pe_w", "tok_base",
    "ln1_g", "ln1_b", "qkv_w", "qkv_b", "proj_w", "proj_b",
    "ln2_g", "ln2_b", "fc1_w", "fc1_b", "fc2_w", "fc2_b",
    "norm_g", "norm_b", "head_ln_g", "head_ln_b", "head_w", "head_b",
)


# ----------------------------- in-kernel helpers (pure value math) -----------------------------
def _mm(a, b):
    """MXU matmul: bf16 operands (f32 operands are cast; bf16 casts are no-ops), f32 acc."""
    return jnp.dot(a.astype(MM_DTYPE), b.astype(MM_DTYPE),
                   preferred_element_type=jnp.float32)


def _layernorm(x, g, b, eps):
    mu = jnp.mean(x, axis=-1, keepdims=True)
    xc = x - mu
    var = jnp.mean(xc * xc, axis=-1, keepdims=True)
    return xc * jax.lax.rsqrt(var + jnp.float32(eps)) * g + b


def _gelu(x):
    # tanh-approximation GELU (see TODO above).
    c = jnp.float32(0.7978845608028654)  # sqrt(2/pi)
    return 0.5 * x * (1.0 + jnp.tanh(c * (x + 0.044715 * x * x * x)))


# ----------------------------- the fused kernel -----------------------------
def _ast_fused_kernel(
    patches_ref,                           # (ROWS, 256) f32; zero rows except patch rows
    attn_bias_ref,                         # (ROWS, ROWS) f32 additive mask (0 / -1e30)
    pe_w_ref,                              # (256, D) bf16 (permuted conv weight)
    base_ref,                              # (ROWS, D) f32: cls/dist + pos + conv bias folded
    ln1_g_ref, ln1_b_ref,                  # (DEPTH, 1, D) f32
    qkv_w_ref, qkv_b_ref,                  # (DEPTH, D, 3D) bf16, (DEPTH, 1, 3D) f32
    proj_w_ref, proj_b_ref,                # (DEPTH, D, D) bf16, (DEPTH, 1, D) f32
    ln2_g_ref, ln2_b_ref,                  # (DEPTH, 1, D) f32
    fc1_w_ref, fc1_b_ref,                  # (DEPTH, D, MLP) bf16, (DEPTH, 1, MLP) f32
    fc2_w_ref, fc2_b_ref,                  # (DEPTH, MLP, D) bf16, (DEPTH, 1, D) f32
    norm_g_ref, norm_b_ref,                # (1, D) f32
    head_ln_g_ref, head_ln_b_ref,          # (1, D) f32
    head_w_ref, head_b_ref,                # (D, HEAD_PAD) bf16, (1, HEAD_PAD) f32
    out_ref,                               # (B, HEAD_PAD) f32
):
    # --- patch embed + cls/dist + pos embed (single matmul + add) ---
    # cls/dist rows and pad rows of `patches` are zero, so the matmul contributes nothing
    # there; base_ref carries cls/dist tokens + pos_embed + conv bias per row (per batch).
    x = _mm(patches_ref[...], pe_w_ref[...]) + base_ref[...]          # (ROWS, D) f32

    attn_bias = attn_bias_ref[...]                                    # (ROWS, ROWS) f32

    for l in range(DEPTH):                                            # static unroll
        # ---------------- MHSA ----------------
        h = _layernorm(x, ln1_g_ref[l], ln1_b_ref[l], 1e-6)
        # 1/sqrt(head_dim) is folded into the q columns of qkv_w / qkv_b at init.
        qkv = _mm(h, qkv_w_ref[l]) + qkv_b_ref[l]                     # (ROWS, 3D)

        head_outs = []
        for hh in range(HEADS):                                       # static unroll
            lo = hh * HEAD_DIM
            q = qkv[:, lo:lo + HEAD_DIM]                              # (ROWS, dh), scaled
            k = qkv[:, EMBED_DIM + lo:EMBED_DIM + lo + HEAD_DIM]
            v = qkv[:, 2 * EMBED_DIM + lo:2 * EMBED_DIM + lo + HEAD_DIM]

            s = jax.lax.dot_general(
                q.astype(MM_DTYPE), k.astype(MM_DTYPE),
                (((1,), (1,)), ((), ())),
                preferred_element_type=jnp.float32)                   # (ROWS, ROWS)
            s = s + attn_bias                                         # block-diag batch mask
            s = s - jnp.max(s, axis=-1, keepdims=True)
            p = jnp.exp(s)
            p = p * pl.reciprocal(jnp.sum(p, axis=-1, keepdims=True), approx=True)
            head_outs.append(_mm(p, v))                               # (ROWS, dh)

        o_cat = jnp.concatenate(head_outs, axis=-1)                   # (ROWS, D)
        x = x + _mm(o_cat, proj_w_ref[l]) + proj_b_ref[l]             # fused residual

        # ---------------- MLP ----------------
        h = _layernorm(x, ln2_g_ref[l], ln2_b_ref[l], 1e-6)
        h = _gelu(_mm(h, fc1_w_ref[l]) + fc1_b_ref[l])
        x = x + _mm(h, fc2_w_ref[l]) + fc2_b_ref[l]                   # fused residual

    # --- final norm, deit pooling (per batch element), classification head ---
    x = _layernorm(x, norm_g_ref[...], norm_b_ref[...], 1e-6)
    pooled = jnp.concatenate(
        [(x[b * SEQ_PAD:b * SEQ_PAD + 1, :] +
          x[b * SEQ_PAD + 1:b * SEQ_PAD + 2, :]) * 0.5
         for b in range(B)], axis=0)                                  # (B, D)  (cls+dist)/2
    pooled = _layernorm(pooled, head_ln_g_ref[...], head_ln_b_ref[...], 1e-5)
    logits = _mm(pooled, head_w_ref[...]) + head_b_ref[...]           # (B, HEAD_PAD)
    out_ref[...] = logits.astype(out_ref.dtype)                       # one lane-dense store


def _full_spec(arr):
    """Whole-array VMEM-resident block (single grid step)."""
    nd = arr.ndim
    return pl.BlockSpec(arr.shape, lambda i, _nd=nd: (0,) * _nd)


# ----------------------------- parameters -----------------------------
def init_params(key):
    def nrm(k, shape, std=0.02):
        return std * jax.random.normal(k, shape, dtype=jnp.float32)

    ks = iter(jax.random.split(key, 64))
    scale = jnp.float32(HEAD_DIM ** -0.5)

    cls_token = nrm(next(ks), (EMBED_DIM,))
    dist_token = nrm(next(ks), (EMBED_DIM,))
    pos_embed = nrm(next(ks), (SEQ, EMBED_DIM))
    pe_b = jnp.zeros((EMBED_DIM,), jnp.float32)   # patch-embed conv bias

    # Fold cls/dist tokens, pos embed and the conv bias into one additive per-token base,
    # tiled per batch element (batch is folded into the sublane axis).
    # Row 0: cls + pos[0]; row 1: dist + pos[1]; rows 2..SEQ-1: pos + conv bias; pad rows: 0.
    tok_base = jnp.zeros((SEQ_PAD, EMBED_DIM), jnp.float32)
    tok_base = tok_base.at[0].set(cls_token + pos_embed[0])
    tok_base = tok_base.at[1].set(dist_token + pos_embed[1])
    tok_base = tok_base.at[2:SEQ].set(pos_embed[2:] + pe_b[None, :])
    tok_base = jnp.tile(tok_base, (B, 1))                              # (ROWS, D)

    # Block-diagonal additive attention mask: a query row may only attend to keys of the
    # same batch element and only to real (non-pad) token columns.
    idx = jnp.arange(ROWS)
    same_batch = (idx[:, None] // SEQ_PAD) == (idx[None, :] // SEQ_PAD)
    valid_key = (idx[None, :] % SEQ_PAD) < SEQ
    attn_bias = jnp.where(same_batch & valid_key, 0.0, -1e30).astype(jnp.float32)

    # Patch-embed Conv2d weight (D, 1, kf=16, kt=16) expressed as a (256, D) matmul weight.
    # The wrapper feeds raw patch rows x[b, ti*16+kt, kf] flattened as j = kt*16 + kf, so
    # the (kf, kt) -> (kt, kf) transpose of the conv weight is folded here (valid: F_DIM==1,
    # non-overlapping 16x16 patches).
    conv_w = nrm(next(ks), (EMBED_DIM, PATCH, PATCH))                  # (D, kf, kt)
    pe_w = jnp.transpose(conv_w, (2, 1, 0)).reshape(PATCH_ELEMS, EMBED_DIM)

    # Classifier weight, padded to a lane-dense 128-wide output (extra cols are zero).
    head_w = jnp.zeros((EMBED_DIM, HEAD_PAD), jnp.float32)
    head_w = head_w.at[:, :LABEL_DIM].set(nrm(next(ks), (EMBED_DIM, LABEL_DIM)))

    def stack(shape):
        return jnp.stack([nrm(next(ks), shape) for _ in range(DEPTH)])

    # qkv: fold the 1/sqrt(head_dim) attention scale into the q columns (zero kernel cost).
    qkv_w = stack((EMBED_DIM, 3 * EMBED_DIM))
    qkv_w = qkv_w.at[:, :, :EMBED_DIM].multiply(scale)
    qkv_b = jnp.zeros((DEPTH, 1, 3 * EMBED_DIM), jnp.float32)
    qkv_b = qkv_b.at[:, :, :EMBED_DIM].multiply(scale)

    bf16 = lambda a: a.astype(MM_DTYPE)   # matmul weights pre-cast once at init

    p = {
        "attn_bias": attn_bias,
        "pe_w": bf16(pe_w),
        "tok_base": tok_base,
        # per-layer weights (stacked along a leading DEPTH axis, indexed statically in-kernel)
        "ln1_g": jnp.ones((DEPTH, 1, EMBED_DIM), jnp.float32),
        "ln1_b": jnp.zeros((DEPTH, 1, EMBED_DIM), jnp.float32),
        "qkv_w": bf16(qkv_w),
        "qkv_b": qkv_b,
        "proj_w": bf16(stack((EMBED_DIM, EMBED_DIM))),
        "proj_b": jnp.zeros((DEPTH, 1, EMBED_DIM), jnp.float32),
        "ln2_g": jnp.ones((DEPTH, 1, EMBED_DIM), jnp.float32),
        "ln2_b": jnp.zeros((DEPTH, 1, EMBED_DIM), jnp.float32),
        "fc1_w": bf16(stack((EMBED_DIM, MLP_HIDDEN))),
        "fc1_b": jnp.zeros((DEPTH, 1, MLP_HIDDEN), jnp.float32),
        "fc2_w": bf16(stack((MLP_HIDDEN, EMBED_DIM))),
        "fc2_b": jnp.zeros((DEPTH, 1, EMBED_DIM), jnp.float32),
        # final norm + mlp_head (LayerNorm + Linear)
        "norm_g": jnp.ones((1, EMBED_DIM), jnp.float32),
        "norm_b": jnp.zeros((1, EMBED_DIM), jnp.float32),
        "head_ln_g": jnp.ones((1, EMBED_DIM), jnp.float32),
        "head_ln_b": jnp.zeros((1, EMBED_DIM), jnp.float32),
        "head_w": bf16(head_w),
        "head_b": jnp.zeros((1, HEAD_PAD), jnp.float32),
    }
    return p


# ----------------------------- model forward -----------------------------
@jax.jit
def ast_forward(params, x):
    """x: (B, T, F) spectrogram -> (B, LABEL_DIM) logits."""
    Bx = x.shape[0]
    # Patch extraction is a pure reshape: x[b, ti*16+kt, kf] -> patch row ti, element
    # kt*16+kf (the (kf,kt)->(kt,kf) permutation is folded into pe_w at init).
    patches = x.reshape(Bx, T_DIM, PATCH_ELEMS)
    # Place patches at token rows [2, 2+NUM_PATCHES) of each batch element's SEQ_PAD rows;
    # cls/dist rows and pad rows stay zero.  Batch is folded into the sublane axis.
    patches = jnp.pad(patches, ((0, 0), (2, SEQ_PAD - 2 - NUM_PATCHES), (0, 0)))
    patches = patches.reshape(Bx * SEQ_PAD, PATCH_ELEMS)

    weight_args = [params[k] for k in _WEIGHT_ORDER]
    in_specs = [_full_spec(patches)] + [_full_spec(w) for w in weight_args]

    out = pl.pallas_call(
        _ast_fused_kernel,
        out_shape=jax.ShapeDtypeStruct((Bx, HEAD_PAD), jnp.float32),
        grid=(1,),                                   # whole forward in one grid step
        in_specs=in_specs,
        out_specs=pl.BlockSpec((Bx, HEAD_PAD), lambda i: (0, 0)),
        compiler_params=pltpu.CompilerParams(
            dimension_semantics=("arbitrary",)),
    )(patches, *weight_args)

    return out[:, :LABEL_DIM]


# ----------------------------- main -----------------------------
if __name__ == "__main__":
    key = jax.random.PRNGKey(0)
    pkey, xkey = jax.random.split(key)
    params = init_params(pkey)
    x = jax.random.normal(xkey, (B, INPUT_TDIM, INPUT_FDIM), dtype=jnp.float32)

    logits = ast_forward(params, x)
    logits = jax.block_until_ready(logits)
    assert logits.shape == (B, LABEL_DIM), logits.shape
    assert bool(jnp.all(jnp.isfinite(logits)))
    print("KERNEL_OK")
</pallas_src>

<mosaic_0001>
module attributes {stable_mosaic.version = 11 : i64} {
  func.func @_ast_fused_kernel(%arg0: i32, %arg1: memref<16x256xf32, #tpu.memory_space<vmem>>, %arg2: memref<16x16xf32, #tpu.memory_space<vmem>>, %arg3: memref<256x64xbf16, #tpu.memory_space<vmem>>, %arg4: memref<16x64xf32, #tpu.memory_space<vmem>>, %arg5: memref<2x1x64xf32, #tpu.memory_space<vmem>>, %arg6: memref<2x1x64xf32, #tpu.memory_space<vmem>>, %arg7: memref<2x64x192xbf16, #tpu.memory_space<vmem>>, %arg8: memref<2x1x192xf32, #tpu.memory_space<vmem>>, %arg9: memref<2x64x64xbf16, #tpu.memory_space<vmem>>, %arg10: memref<2x1x64xf32, #tpu.memory_space<vmem>>, %arg11: memref<2x1x64xf32, #tpu.memory_space<vmem>>, %arg12: memref<2x1x64xf32, #tpu.memory_space<vmem>>, %arg13: memref<2x64x256xbf16, #tpu.memory_space<vmem>>, %arg14: memref<2x1x256xf32, #tpu.memory_space<vmem>>, %arg15: memref<2x256x64xbf16, #tpu.memory_space<vmem>>, %arg16: memref<2x1x64xf32, #tpu.memory_space<vmem>>, %arg17: memref<1x64xf32, #tpu.memory_space<vmem>>, %arg18: memref<1x64xf32, #tpu.memory_space<vmem>>, %arg19: memref<1x64xf32, #tpu.memory_space<vmem>>, %arg20: memref<1x64xf32, #tpu.memory_space<vmem>>, %arg21: memref<64x128xbf16, #tpu.memory_space<vmem>>, %arg22: memref<1x128xf32, #tpu.memory_space<vmem>>, %arg23: memref<2x128xf32, #tpu.memory_space<vmem>>) attributes {dimension_semantics = [#tpu.dimension_semantics<arbitrary>], iteration_bounds = array<i64: 1>, scalar_prefetch = 0 : i64, scratch_operands = 0 : i64, tpu.core_type = #tpu.core_type<tc>, window_params = [{pipeline_mode = #tpu.pipeline_mode<synchronous>, transform_indices = @transform_0, window_bounds = array<i64: 16, 256>}, {pipeline_mode = #tpu.pipeline_mode<synchronous>, transform_indices = @transform_1, window_bounds = array<i64: 16, 16>}, {pipeline_mode = #tpu.pipeline_mode<synchronous>, transform_indices = @transform_2, window_bounds = array<i64: 256, 64>}, {pipeline_mode = #tpu.pipeline_mode<synchronous>, transform_indices = @transform_3, window_bounds = array<i64: 16, 64>}, {pipeline_mode = #tpu.pipeline_mode<synchronous>, transform_indices = @transform_4, window_bounds = array<i64: 2, 1, 64>}, {pipeline_mode = #tpu.pipeline_mode<synchronous>, transform_indices = @transform_5, window_bounds = array<i64: 2, 1, 64>}, {pipeline_mode = #tpu.pipeline_mode<synchronous>, transform_indices = @transform_6, window_bounds = array<i64: 2, 64, 192>}, {pipeline_mode = #tpu.pipeline_mode<synchronous>, transform_indices = @transform_7, window_bounds = array<i64: 2, 1, 192>}, {pipeline_mode = #tpu.pipeline_mode<synchronous>, transform_indices = @transform_8, window_bounds = array<i64: 2, 64, 64>}, {pipeline_mode = #tpu.pipeline_mode<synchronous>, transform_indices = @transform_9, window_bounds = array<i64: 2, 1, 64>}, {pipeline_mode = #tpu.pipeline_mode<synchronous>, transform_indices = @transform_10, window_bounds = array<i64: 2, 1, 64>}, {pipeline_mode = #tpu.pipeline_mode<synchronous>, transform_indices = @transform_11, window_bounds = array<i64: 2, 1, 64>}, {pipeline_mode = #tpu.pipeline_mode<synchronous>, transform_indices = @transform_12, window_bounds = array<i64: 2, 64, 256>}, {pipeline_mode = #tpu.pipeline_mode<synchronous>, transform_indices = @transform_13, window_bounds = array<i64: 2, 1, 256>}, {pipeline_mode = #tpu.pipeline_mode<synchronous>, transform_indices = @transform_14, window_bounds = array<i64: 2, 256, 64>}, {pipeline_mode = #tpu.pipeline_mode<synchronous>, transform_indices = @transform_15, window_bounds = array<i64: 2, 1, 64>}, {pipeline_mode = #tpu.pipeline_mode<synchronous>, transform_indices = @transform_16, window_bounds = array<i64: 1, 64>}, {pipeline_mode = #tpu.pipeline_mode<synchronous>, transform_indices = @transform_17, window_bounds = array<i64: 1, 64>}, {pipeline_mode = #tpu.pipeline_mode<synchronous>, transform_indices = @transform_18, window_bounds = array<i64: 1, 64>}, {pipeline_mode = #tpu.pipeline_mode<synchronous>, transform_indices = @transform_19, window_bounds = array<i64: 1, 64>}, {pipeline_mode = #tpu.pipeline_mode<synchronous>, transform_indices = @transform_20, window_bounds = array<i64: 64, 128>}, {pipeline_mode = #tpu.pipeline_mode<synchronous>, transform_indices = @transform_21, window_bounds = array<i64: 1, 128>}, {pipeline_mode = #tpu.pipeline_mode<synchronous>, transform_indices = @transform_22, window_bounds = array<i64: 2, 128>}]} {
    %c0 = arith.constant 0 : index
    %c0_0 = arith.constant 0 : index
    %0 = vector.load %arg1[%c0, %c0_0] : memref<16x256xf32, #tpu.memory_space<vmem>>, vector<16x256xf32>
    %c0_1 = arith.constant 0 : index
    %c0_2 = arith.constant 0 : index
    %1 = vector.load %arg3[%c0_1, %c0_2] : memref<256x64xbf16, #tpu.memory_space<vmem>>, vector<256x64xbf16>
    %2 = arith.truncf %0 : vector<16x256xf32> to vector<16x256xbf16>
    %cst = arith.constant dense<0.000000e+00> : vector<16x64xf32>
    %3 = tpu.matmul %2, %1, %cst {dimension_numbers = #tpu.dot_dimension_numbers<[1], [0], [0], [1], [0, 0, 1, 1], [], []>} : vector<16x256xbf16>, vector<256x64xbf16>, vector<16x64xf32> -> vector<16x64xf32>
    %c0_3 = arith.constant 0 : index
    %c0_4 = arith.constant 0 : index
    %4 = vector.load %arg4[%c0_3, %c0_4] : memref<16x64xf32, #tpu.memory_space<vmem>>, vector<16x64xf32>
    %5 = arith.addf %3, %4 : vector<16x64xf32>
    %c0_5 = arith.constant 0 : index
    %c0_6 = arith.constant 0 : index
    %6 = vector.load %arg2[%c0_5, %c0_6] : memref<16x16xf32, #tpu.memory_space<vmem>>, vector<16x16xf32>
    %c0_7 = arith.constant 0 : index
    %c0_8 = arith.constant 0 : index
    %c0_9 = arith.constant 0 : index
    %7 = vector.load %arg5[%c0_7, %c0_8, %c0_9] : memref<2x1x64xf32, #tpu.memory_space<vmem>>, vector<1x1x64xf32>
    %8 = vector.shape_cast %7 : vector<1x1x64xf32> to vector<1x64xf32>
    %c0_10 = arith.constant 0 : index
    %c0_11 = arith.constant 0 : index
    %c0_12 = arith.constant 0 : index
    %9 = vector.load %arg6[%c0_10, %c0_11, %c0_12] : memref<2x1x64xf32, #tpu.memory_space<vmem>>, vector<1x1x64xf32>
    %10 = vector.shape_cast %9 : vector<1x1x64xf32> to vector<1x64xf32>
    %cst_13 = arith.constant dense<0.000000e+00> : vector<16xf32>
    %11 = vector.multi_reduction <add>, %5, %cst_13 [1] : vector<16x64xf32> to vector<16xf32>
    %12 = vector.shape_cast %11 : vector<16xf32> to vector<16x1xf32>
    %cst_14 = arith.constant 6.400000e+01 : f32
    %13 = vector.broadcast %cst_14 : f32 to vector<16x1xf32>
    %14 = arith.divf %12, %13 : vector<16x1xf32>
    %15 = vector.broadcast %14 : vector<16x1xf32> to vector<16x64xf32>
    %16 = arith.subf %5, %15 : vector<16x64xf32>
    %17 = arith.mulf %16, %16 : vector<16x64xf32>
    %cst_15 = arith.constant dense<0.000000e+00> : vector<16xf32>
    %18 = vector.multi_reduction <add>, %17, %cst_15 [1] : vector<16x64xf32> to vector<16xf32>
    %19 = vector.shape_cast %18 : vector<16xf32> to vector<16x1xf32>
    %cst_16 = arith.constant 6.400000e+01 : f32
    %20 = vector.broadcast %cst_16 : f32 to vector<16x1xf32>
    %21 = arith.divf %19, %20 : vector<16x1xf32>
    %cst_17 = arith.constant 9.99999997E-7 : f32
    %22 = vector.broadcast %cst_17 : f32 to vector<16x1xf32>
    %23 = arith.addf %21, %22 : vector<16x1xf32>
    %24 = math.rsqrt %23 : vector<16x1xf32>
    %25 = vector.broadcast %24 : vector<16x1xf32> to vector<16x64xf32>
    %26 = arith.mulf %16, %25 : vector<16x64xf32>
    %27 = vector.broadcast %8 : vector<1x64xf32> to vector<16x64xf32>
    %28 = arith.mulf %26, %27 : vector<16x64xf32>
    %29 = vector.broadcast %10 : vector<1x64xf32> to vector<16x64xf32>
    %30 = arith.addf %28, %29 : vector<16x64xf32>
    %c0_18 = arith.constant 0 : index
    %c0_19 = arith.constant 0 : index
    %c0_20 = arith.constant 0 : index
    %31 = vector.load %arg7[%c0_18, %c0_19, %c0_20] : memref<2x64x192xbf16, #tpu.memory_space<vmem>>, vector<1x64x192xbf16>
    %32 = vector.shape_cast %31 : vector<1x64x192xbf16> to vector<64x192xbf16>
    %33 = arith.truncf %30 : vector<16x64xf32> to vector<16x64xbf16>
    %cst_21 = arith.constant dense<0.000000e+00> : vector<16x192xf32>
    %34 = tpu.matmul %33, %32, %cst_21 {dimension_numbers = #tpu.dot_dimension_numbers<[1], [0], [0], [1], [0, 0, 1, 1], [], []>} : vector<16x64xbf16>, vector<64x192xbf16>, vector<16x192xf32> -> vector<16x192xf32>
    %c0_22 = arith.constant 0 : index
    %c0_23 = arith.constant 0 : index
    %c0_24 = arith.constant 0 : index
    %35 = vector.load %arg8[%c0_22, %c0_23, %c0_24] : memref<2x1x192xf32, #tpu.memory_space<vmem>>, vector<1x1x192xf32>
    %36 = vector.shape_cast %35 : vector<1x1x192xf32> to vector<1x192xf32>
    %37 = vector.broadcast %36 : vector<1x192xf32> to vector<16x192xf32>
    %38 = arith.addf %34, %37 : vector<16x192xf32>
    %39 = vector.extract_strided_slice %38 {offsets = [0, 0], sizes = [16, 16], strides = [1, 1]} : vector<16x192xf32> to vector<16x16xf32>
    %40 = vector.extract_strided_slice %38 {offsets = [0, 64], sizes = [16, 16], strides = [1, 1]} : vector<16x192xf32> to vector<16x16xf32>
    %41 = vector.extract_strided_slice %38 {offsets = [0, 128], sizes = [16, 16], strides = [1, 1]} : vector<16x192xf32> to vector<16x16xf32>
    %42 = arith.truncf %39 : vector<16x16xf32> to vector<16x16xbf16>
    %43 = arith.truncf %40 : vector<16x16xf32> to vector<16x16xbf16>
    %cst_25 = arith.constant dense<0.000000e+00> : vector<16x16xf32>
    %44 = tpu.matmul %42, %43, %cst_25 {dimension_numbers = #tpu.dot_dimension_numbers<[1], [1], [0], [0], [0, 0, 1, 0], [], []>} : vector<16x16xbf16>, vector<16x16xbf16>, vector<16x16xf32> -> vector<16x16xf32>
    %45 = arith.addf %44, %6 : vector<16x16xf32>
    %cst_26 = arith.constant dense<0xFF800000> : vector<16xf32>
    %46 = vector.multi_reduction <maximumf>, %45, %cst_26 [1] : vector<16x16xf32> to vector<16xf32>
    %47 = vector.shape_cast %46 : vector<16xf32> to vector<16x1xf32>
    %48 = vector.broadcast %47 : vector<16x1xf32> to vector<16x16xf32>
    %49 = arith.subf %45, %48 : vector<16x16xf32>
    %50 = math.exp %49 : vector<16x16xf32>
    %cst_27 = arith.constant dense<0.000000e+00> : vector<16xf32>
    %51 = vector.multi_reduction <add>, %50, %cst_27 [1] : vector<16x16xf32> to vector<16xf32>
    %52 = vector.shape_cast %51 : vector<16xf32> to vector<16x1xf32>
    %53 = tpu.reciprocal %52 {approx = true} : vector<16x1xf32> -> vector<16x1xf32>
    %54 = vector.broadcast %53 : vector<16x1xf32> to vector<16x16xf32>
    %55 = arith.mulf %50, %54 : vector<16x16xf32>
    %56 = arith.truncf %55 : vector<16x16xf32> to vector<16x16xbf16>
    %57 = arith.truncf %41 : vector<16x16xf32> to vector<16x16xbf16>
    %cst_28 = arith.constant dense<0.000000e+00> : vector<16x16xf32>
    %58 = tpu.matmul %56, %57, %cst_28 {dimension_numbers = #tpu.dot_dimension_numbers<[1], [0], [0], [1], [0, 0, 1, 1], [], []>} : vector<16x16xbf16>, vector<16x16xbf16>, vector<16x16xf32> -> vector<16x16xf32>
    %59 = vector.extract_strided_slice %38 {offsets = [0, 16], sizes = [16, 16], strides = [1, 1]} : vector<16x192xf32> to vector<16x16xf32>
    %60 = vector.extract_strided_slice %38 {offsets = [0, 80], sizes = [16, 16], strides = [1, 1]} : vector<16x192xf32> to vector<16x16xf32>
    %61 = vector.extract_strided_slice %38 {offsets = [0, 144], sizes = [16, 16], strides = [1, 1]} : vector<16x192xf32> to vector<16x16xf32>
    %62 = arith.truncf %59 : vector<16x16xf32> to vector<16x16xbf16>
    %63 = arith.truncf %60 : vector<16x16xf32> to vector<16x16xbf16>
    %cst_29 = arith.constant dense<0.000000e+00> : vector<16x16xf32>
    %64 = tpu.matmul %62, %63, %cst_29 {dimension_numbers = #tpu.dot_dimension_numbers<[1], [1], [0], [0], [0, 0, 1, 0], [], []>} : vector<16x16xbf16>, vector<16x16xbf16>, vector<16x16xf32> -> vector<16x16xf32>
    %65 = arith.addf %64, %6 : vector<16x16xf32>
    %cst_30 = arith.constant dense<0xFF800000> : vector<16xf32>
    %66 = vector.multi_reduction <maximumf>, %65, %cst_30 [1] : vector<16x16xf32> to vector<16xf32>
    %67 = vector.shape_cast %66 : vector<16xf32> to vector<16x1xf32>
    %68 = vector.broadcast %67 : vector<16x1xf32> to vector<16x16xf32>
    %69 = arith.subf %65, %68 : vector<16x16xf32>
    %70 = math.exp %69 : vector<16x16xf32>
    %cst_31 = arith.constant dense<0.000000e+00> : vector<16xf32>
    %71 = vector.multi_reduction <add>, %70, %cst_31 [1] : vector<16x16xf32> to vector<16xf32>
    %72 = vector.shape_cast %71 : vector<16xf32> to vector<16x1xf32>
    %73 = tpu.reciprocal %72 {approx = true} : vector<16x1xf32> -> vector<16x1xf32>
    %74 = vector.broadcast %73 : vector<16x1xf32> to vector<16x16xf32>
    %75 = arith.mulf %70, %74 : vector<16x16xf32>
    %76 = arith.truncf %75 : vector<16x16xf32> to vector<16x16xbf16>
    %77 = arith.truncf %61 : vector<16x16xf32> to vector<16x16xbf16>
    %cst_32 = arith.constant dense<0.000000e+00> : vector<16x16xf32>
    %78 = tpu.matmul %76, %77, %cst_32 {dimension_numbers = #tpu.dot_dimension_numbers<[1], [0], [0], [1], [0, 0, 1, 1], [], []>} : vector<16x16xbf16>, vector<16x16xbf16>, vector<16x16xf32> -> vector<16x16xf32>
    %79 = vector.extract_strided_slice %38 {offsets = [0, 32], sizes = [16, 16], strides = [1, 1]} : vector<16x192xf32> to vector<16x16xf32>
    %80 = vector.extract_strided_slice %38 {offsets = [0, 96], sizes = [16, 16], strides = [1, 1]} : vector<16x192xf32> to vector<16x16xf32>
    %81 = vector.extract_strided_slice %38 {offsets = [0, 160], sizes = [16, 16], strides = [1, 1]} : vector<16x192xf32> to vector<16x16xf32>
    %82 = arith.truncf %79 : vector<16x16xf32> to vector<16x16xbf16>
    %83 = arith.truncf %80 : vector<16x16xf32> to vector<16x16xbf16>
    %cst_33 = arith.constant dense<0.000000e+00> : vector<16x16xf32>
    %84 = tpu.matmul %82, %83, %cst_33 {dimension_numbers = #tpu.dot_dimension_numbers<[1], [1], [0], [0], [0, 0, 1, 0], [], []>} : vector<16x16xbf16>, vector<16x16xbf16>, vector<16x16xf32> -> vector<16x16xf32>
    %85 = arith.addf %84, %6 : vector<16x16xf32>
    %cst_34 = arith.constant dense<0xFF800000> : vector<16xf32>
    %86 = vector.multi_reduction <maximumf>, %85, %cst_34 [1] : vector<16x16xf32> to vector<16xf32>
    %87 = vector.shape_cast %86 : vector<16xf32> to vector<16x1xf32>
    %88 = vector.broadcast %87 : vector<16x1xf32> to vector<16x16xf32>
    %89 = arith.subf %85, %88 : vector<16x16xf32>
    %90 = math.exp %89 : vector<16x16xf32>
    %cst_35 = arith.constant dense<0.000000e+00> : vector<16xf32>
    %91 = vector.multi_reduction <add>, %90, %cst_35 [1] : vector<16x16xf32> to vector<16xf32>
    %92 = vector.shape_cast %91 : vector<16xf32> to vector<16x1xf32>
    %93 = tpu.reciprocal %92 {approx = true} : vector<16x1xf32> -> vector<16x1xf32>
    %94 = vector.broadcast %93 : vector<16x1xf32> to vector<16x16xf32>
    %95 = arith.mulf %90, %94 : vector<16x16xf32>
    %96 = arith.truncf %95 : vector<16x16xf32> to vector<16x16xbf16>
    %97 = arith.truncf %81 : vector<16x16xf32> to vector<16x16xbf16>
    %cst_36 = arith.constant dense<0.000000e+00> : vector<16x16xf32>
    %98 = tpu.matmul %96, %97, %cst_36 {dimension_numbers = #tpu.dot_dimension_numbers<[1], [0], [0], [1], [0, 0, 1, 1], [], []>} : vector<16x16xbf16>, vector<16x16xbf16>, vector<16x16xf32> -> vector<16x16xf32>
    %99 = vector.extract_strided_slice %38 {offsets = [0, 48], sizes = [16, 16], strides = [1, 1]} : vector<16x192xf32> to vector<16x16xf32>
    %100 = vector.extract_strided_slice %38 {offsets = [0, 112], sizes = [16, 16], strides = [1, 1]} : vector<16x192xf32> to vector<16x16xf32>
    %101 = vector.extract_strided_slice %38 {offsets = [0, 176], sizes = [16, 16], strides = [1, 1]} : vector<16x192xf32> to vector<16x16xf32>
    %102 = arith.truncf %99 : vector<16x16xf32> to vector<16x16xbf16>
    %103 = arith.truncf %100 : vector<16x16xf32> to vector<16x16xbf16>
    %cst_37 = arith.constant dense<0.000000e+00> : vector<16x16xf32>
    %104 = tpu.matmul %102, %103, %cst_37 {dimension_numbers = #tpu.dot_dimension_numbers<[1], [1], [0], [0], [0, 0, 1, 0], [], []>} : vector<16x16xbf16>, vector<16x16xbf16>, vector<16x16xf32> -> vector<16x16xf32>
    %105 = arith.addf %104, %6 : vector<16x16xf32>
    %cst_38 = arith.constant dense<0xFF800000> : vector<16xf32>
    %106 = vector.multi_reduction <maximumf>, %105, %cst_38 [1] : vector<16x16xf32> to vector<16xf32>
    %107 = vector.shape_cast %106 : vector<16xf32> to vector<16x1xf32>
    %108 = vector.broadcast %107 : vector<16x1xf32> to vector<16x16xf32>
    %109 = arith.subf %105, %108 : vector<16x16xf32>
    %110 = math.exp %109 : vector<16x16xf32>
    %cst_39 = arith.constant dense<0.000000e+00> : vector<16xf32>
    %111 = vector.multi_reduction <add>, %110, %cst_39 [1] : vector<16x16xf32> to vector<16xf32>
    %112 = vector.shape_cast %111 : vector<16xf32> to vector<16x1xf32>
    %113 = tpu.reciprocal %112 {approx = true} : vector<16x1xf32> -> vector<16x1xf32>
    %114 = vector.broadcast %113 : vector<16x1xf32> to vector<16x16xf32>
    %115 = arith.mulf %110, %114 : vector<16x16xf32>
    %116 = arith.truncf %115 : vector<16x16xf32> to vector<16x16xbf16>
    %117 = arith.truncf %101 : vector<16x16xf32> to vector<16x16xbf16>
    %cst_40 = arith.constant dense<0.000000e+00> : vector<16x16xf32>
    %118 = tpu.matmul %116, %117, %cst_40 {dimension_numbers = #tpu.dot_dimension_numbers<[1], [0], [0], [1], [0, 0, 1, 1], [], []>} : vector<16x16xbf16>, vector<16x16xbf16>, vector<16x16xf32> -> vector<16x16xf32>
    %119 = tpu.concatenate %58, %78, %98, %118 in 1 : vector<16x16xf32>, vector<16x16xf32>, vector<16x16xf32>, vector<16x16xf32> -> vector<16x64xf32>
    %c0_41 = arith.constant 0 : index
    %c0_42 = arith.constant 0 : index
    %c0_43 = arith.constant 0 : index
    %120 = vector.load %arg9[%c0_41, %c0_42, %c0_43] : memref<2x64x64xbf16, #tpu.memory_space<vmem>>, vector<1x64x64xbf16>
    %121 = vector.shape_cast %120 : vector<1x64x64xbf16> to vector<64x64xbf16>
    %122 = arith.truncf %119 : vector<16x64xf32> to vector<16x64xbf16>
    %cst_44 = arith.constant dense<0.000000e+00> : vector<16x64xf32>
    %123 = tpu.matmul %122, %121, %cst_44 {dimension_numbers = #tpu.dot_dimension_numbers<[1], [0], [0], [1], [0, 0, 1, 1], [], []>} : vector<16x64xbf16>, vector<64x64xbf16>, vector<16x64xf32> -> vector<16x64xf32>
    %124 = arith.addf %5, %123 : vector<16x64xf32>
    %c0_45 = arith.constant 0 : index
    %c0_46 = arith.constant 0 : index
    %c0_47 = arith.constant 0 : index
    %125 = vector.load %arg10[%c0_45, %c0_46, %c0_47] : memref<2x1x64xf32, #tpu.memory_space<vmem>>, vector<1x1x64xf32>
    %126 = vector.shape_cast %125 : vector<1x1x64xf32> to vector<1x64xf32>
    %127 = vector.broadcast %126 : vector<1x64xf32> to vector<16x64xf32>
    %128 = arith.addf %124, %127 : vector<16x64xf32>
    %c0_48 = arith.constant 0 : index
    %c0_49 = arith.constant 0 : index
    %c0_50 = arith.constant 0 : index
    %129 = vector.load %arg11[%c0_48, %c0_49, %c0_50] : memref<2x1x64xf32, #tpu.memory_space<vmem>>, vector<1x1x64xf32>
    %130 = vector.shape_cast %129 : vector<1x1x64xf32> to vector<1x64xf32>
    %c0_51 = arith.constant 0 : index
    %c0_52 = arith.constant 0 : index
    %c0_53 = arith.constant 0 : index
    %131 = vector.load %arg12[%c0_51, %c0_52, %c0_53] : memref<2x1x64xf32, #tpu.memory_space<vmem>>, vector<1x1x64xf32>
    %132 = vector.shape_cast %131 : vector<1x1x64xf32> to vector<1x64xf32>
    %cst_54 = arith.constant dense<0.000000e+00> : vector<16xf32>
    %133 = vector.multi_reduction <add>, %128, %cst_54 [1] : vector<16x64xf32> to vector<16xf32>
    %134 = vector.shape_cast %133 : vector<16xf32> to vector<16x1xf32>
    %cst_55 = arith.constant 6.400000e+01 : f32
    %135 = vector.broadcast %cst_55 : f32 to vector<16x1xf32>
    %136 = arith.divf %134, %135 : vector<16x1xf32>
    %137 = vector.broadcast %136 : vector<16x1xf32> to vector<16x64xf32>
    %138 = arith.subf %128, %137 : vector<16x64xf32>
    %139 = arith.mulf %138, %138 : vector<16x64xf32>
    %cst_56 = arith.constant dense<0.000000e+00> : vector<16xf32>
    %140 = vector.multi_reduction <add>, %139, %cst_56 [1] : vector<16x64xf32> to vector<16xf32>
    %141 = vector.shape_cast %140 : vector<16xf32> to vector<16x1xf32>
    %cst_57 = arith.constant 6.400000e+01 : f32
    %142 = vector.broadcast %cst_57 : f32 to vector<16x1xf32>
    %143 = arith.divf %141, %142 : vector<16x1xf32>
    %cst_58 = arith.constant 9.99999997E-7 : f32
    %144 = vector.broadcast %cst_58 : f32 to vector<16x1xf32>
    %145 = arith.addf %143, %144 : vector<16x1xf32>
    %146 = math.rsqrt %145 : vector<16x1xf32>
    %147 = vector.broadcast %146 : vector<16x1xf32> to vector<16x64xf32>
    %148 = arith.mulf %138, %147 : vector<16x64xf32>
    %149 = vector.broadcast %130 : vector<1x64xf32> to vector<16x64xf32>
    %150 = arith.mulf %148, %149 : vector<16x64xf32>
    %151 = vector.broadcast %132 : vector<1x64xf32> to vector<16x64xf32>
    %152 = arith.addf %150, %151 : vector<16x64xf32>
    %c0_59 = arith.constant 0 : index
    %c0_60 = arith.constant 0 : index
    %c0_61 = arith.constant 0 : index
    %153 = vector.load %arg13[%c0_59, %c0_60, %c0_61] : memref<2x64x256xbf16, #tpu.memory_space<vmem>>, vector<1x64x256xbf16>
    %154 = vector.shape_cast %153 : vector<1x64x256xbf16> to vector<64x256xbf16>
    %155 = arith.truncf %152 : vector<16x64xf32> to vector<16x64xbf16>
    %cst_62 = arith.constant dense<0.000000e+00> : vector<16x256xf32>
    %156 = tpu.matmul %155, %154, %cst_62 {dimension_numbers = #tpu.dot_dimension_numbers<[1], [0], [0], [1], [0, 0, 1, 1], [], []>} : vector<16x64xbf16>, vector<64x256xbf16>, vector<16x256xf32> -> vector<16x256xf32>
    %c0_63 = arith.constant 0 : index
    %c0_64 = arith.constant 0 : index
    %c0_65 = arith.constant 0 : index
    %157 = vector.load %arg14[%c0_63, %c0_64, %c0_65] : memref<2x1x256xf32, #tpu.memory_space<vmem>>, vector<1x1x256xf32>
    %158 = vector.shape_cast %157 : vector<1x1x256xf32> to vector<1x256xf32>
    %159 = vector.broadcast %158 : vector<1x256xf32> to vector<16x256xf32>
    %160 = arith.addf %156, %159 : vector<16x256xf32>
    %cst_66 = arith.constant 5.000000e-01 : f32
    %161 = vector.broadcast %cst_66 : f32 to vector<16x256xf32>
    %162 = arith.mulf %161, %160 : vector<16x256xf32>
    %cst_67 = arith.constant 4.471500e-02 : f32
    %163 = vector.broadcast %cst_67 : f32 to vector<16x256xf32>
    %164 = arith.mulf %163, %160 : vector<16x256xf32>
    %165 = arith.mulf %164, %160 : vector<16x256xf32>
    %166 = arith.mulf %165, %160 : vector<16x256xf32>
    %167 = arith.addf %160, %166 : vector<16x256xf32>
    %cst_68 = arith.constant 0.797884583 : f32
    %168 = vector.broadcast %cst_68 : f32 to vector<16x256xf32>
    %169 = arith.mulf %168, %167 : vector<16x256xf32>
    %170 = math.tanh %169 : vector<16x256xf32>
    %cst_69 = arith.constant 1.000000e+00 : f32
    %171 = vector.broadcast %cst_69 : f32 to vector<16x256xf32>
    %172 = arith.addf %171, %170 : vector<16x256xf32>
    %173 = arith.mulf %162, %172 : vector<16x256xf32>
    %c0_70 = arith.constant 0 : index
    %c0_71 = arith.constant 0 : index
    %c0_72 = arith.constant 0 : index
    %174 = vector.load %arg15[%c0_70, %c0_71, %c0_72] : memref<2x256x64xbf16, #tpu.memory_space<vmem>>, vector<1x256x64xbf16>
    %175 = vector.shape_cast %174 : vector<1x256x64xbf16> to vector<256x64xbf16>
    %176 = arith.truncf %173 : vector<16x256xf32> to vector<16x256xbf16>
    %cst_73 = arith.constant dense<0.000000e+00> : vector<16x64xf32>
    %177 = tpu.matmul %176, %175, %cst_73 {dimension_numbers = #tpu.dot_dimension_numbers<[1], [0], [0], [1], [0, 0, 1, 1], [], []>} : vector<16x256xbf16>, vector<256x64xbf16>, vector<16x64xf32> -> vector<16x64xf32>
    %178 = arith.addf %128, %177 : vector<16x64xf32>
    %c0_74 = arith.constant 0 : index
    %c0_75 = arith.constant 0 : index
    %c0_76 = arith.constant 0 : index
    %179 = vector.load %arg16[%c0_74, %c0_75, %c0_76] : memref<2x1x64xf32, #tpu.memory_space<vmem>>, vector<1x1x64xf32>
    %180 = vector.shape_cast %179 : vector<1x1x64xf32> to vector<1x64xf32>
    %181 = vector.broadcast %180 : vector<1x64xf32> to vector<16x64xf32>
    %182 = arith.addf %178, %181 : vector<16x64xf32>
    %c1 = arith.constant 1 : index
    %c0_77 = arith.constant 0 : index
    %c0_78 = arith.constant 0 : index
    %183 = vector.load %arg5[%c1, %c0_77, %c0_78] : memref<2x1x64xf32, #tpu.memory_space<vmem>>, vector<1x1x64xf32>
    %184 = vector.shape_cast %183 : vector<1x1x64xf32> to vector<1x64xf32>
    %c1_79 = arith.constant 1 : index
    %c0_80 = arith.constant 0 : index
    %c0_81 = arith.constant 0 : index
    %185 = vector.load %arg6[%c1_79, %c0_80, %c0_81] : memref<2x1x64xf32, #tpu.memory_space<vmem>>, vector<1x1x64xf32>
    %186 = vector.shape_cast %185 : vector<1x1x64xf32> to vector<1x64xf32>
    %cst_82 = arith.constant dense<0.000000e+00> : vector<16xf32>
    %187 = vector.multi_reduction <add>, %182, %cst_82 [1] : vector<16x64xf32> to vector<16xf32>
    %188 = vector.shape_cast %187 : vector<16xf32> to vector<16x1xf32>
    %cst_83 = arith.constant 6.400000e+01 : f32
    %189 = vector.broadcast %cst_83 : f32 to vector<16x1xf32>
    %190 = arith.divf %188, %189 : vector<16x1xf32>
    %191 = vector.broadcast %190 : vector<16x1xf32> to vector<16x64xf32>
    %192 = arith.subf %182, %191 : vector<16x64xf32>
    %193 = arith.mulf %192, %192 : vector<16x64xf32>
    %cst_84 = arith.constant dense<0.000000e+00> : vector<16xf32>
    %194 = vector.multi_reduction <add>, %193, %cst_84 [1] : vector<16x64xf32> to vector<16xf32>
    %195 = vector.shape_cast %194 : vector<16xf32> to vector<16x1xf32>
    %cst_85 = arith.constant 6.400000e+01 : f32
    %196 = vector.broadcast %cst_85 : f32 to vector<16x1xf32>
    %197 = arith.divf %195, %196 : vector<16x1xf32>
    %cst_86 = arith.constant 9.99999997E-7 : f32
    %198 = vector.broadcast %cst_86 : f32 to vector<16x1xf32>
    %199 = arith.addf %197, %198 : vector<16x1xf32>
    %200 = math.rsqrt %199 : vector<16x1xf32>
    %201 = vector.broadcast %200 : vector<16x1xf32> to vector<16x64xf32>
    %202 = arith.mulf %192, %201 : vector<16x64xf32>
    %203 = vector.broadcast %184 : vector<1x64xf32> to vector<16x64xf32>
    %204 = arith.mulf %202, %203 : vector<16x64xf32>
    %205 = vector.broadcast %186 : vector<1x64xf32> to vector<16x64xf32>
    %206 = arith.addf %204, %205 : vector<16x64xf32>
    %c1_87 = arith.constant 1 : index
    %c0_88 = arith.constant 0 : index
    %c0_89 = arith.constant 0 : index
    %207 = vector.load %arg7[%c1_87, %c0_88, %c0_89] : memref<2x64x192xbf16, #tpu.memory_space<vmem>>, vector<1x64x192xbf16>
    %208 = vector.shape_cast %207 : vector<1x64x192xbf16> to vector<64x192xbf16>
    %209 = arith.truncf %206 : vector<16x64xf32> to vector<16x64xbf16>
    %cst_90 = arith.constant dense<0.000000e+00> : vector<16x192xf32>
    %210 = tpu.matmul %209, %208, %cst_90 {dimension_numbers = #tpu.dot_dimension_numbers<[1], [0], [0], [1], [0, 0, 1, 1], [], []>} : vector<16x64xbf16>, vector<64x192xbf16>, vector<16x192xf32> -> vector<16x192xf32>
    %c1_91 = arith.constant 1 : index
    %c0_92 = arith.constant 0 : index
    %c0_93 = arith.constant 0 : index
    %211 = vector.load %arg8[%c1_91, %c0_92, %c0_93] : memref<2x1x192xf32, #tpu.memory_space<vmem>>, vector<1x1x192xf32>
    %212 = vector.shape_cast %211 : vector<1x1x192xf32> to vector<1x192xf32>
    %213 = vector.broadcast %212 : vector<1x192xf32> to vector<16x192xf32>
    %214 = arith.addf %210, %213 : vector<16x192xf32>
    %215 = vector.extract_strided_slice %214 {offsets = [0, 0], sizes = [16, 16], strides = [1, 1]} : vector<16x192xf32> to vector<16x16xf32>
    %216 = vector.extract_strided_slice %214 {offsets = [0, 64], sizes = [16, 16], strides = [1, 1]} : vector<16x192xf32> to vector<16x16xf32>
    %217 = vector.extract_strided_slice %214 {offsets = [0, 128], sizes = [16, 16], strides = [1, 1]} : vector<16x192xf32> to vector<16x16xf32>
    %218 = arith.truncf %215 : vector<16x16xf32> to vector<16x16xbf16>
    %219 = arith.truncf %216 : vector<16x16xf32> to vector<16x16xbf16>
    %cst_94 = arith.constant dense<0.000000e+00> : vector<16x16xf32>
    %220 = tpu.matmul %218, %219, %cst_94 {dimension_numbers = #tpu.dot_dimension_numbers<[1], [1], [0], [0], [0, 0, 1, 0], [], []>} : vector<16x16xbf16>, vector<16x16xbf16>, vector<16x16xf32> -> vector<16x16xf32>
    %221 = arith.addf %220, %6 : vector<16x16xf32>
    %cst_95 = arith.constant dense<0xFF800000> : vector<16xf32>
    %222 = vector.multi_reduction <maximumf>, %221, %cst_95 [1] : vector<16x16xf32> to vector<16xf32>
    %223 = vector.shape_cast %222 : vector<16xf32> to vector<16x1xf32>
    %224 = vector.broadcast %223 : vector<16x1xf32> to vector<16x16xf32>
    %225 = arith.subf %221, %224 : vector<16x16xf32>
    %226 = math.exp %225 : vector<16x16xf32>
    %cst_96 = arith.constant dense<0.000000e+00> : vector<16xf32>
    %227 = vector.multi_reduction <add>, %226, %cst_96 [1] : vector<16x16xf32> to vector<16xf32>
    %228 = vector.shape_cast %227 : vector<16xf32> to vector<16x1xf32>
    %229 = tpu.reciprocal %228 {approx = true} : vector<16x1xf32> -> vector<16x1xf32>
    %230 = vector.broadcast %229 : vector<16x1xf32> to vector<16x16xf32>
    %231 = arith.mulf %226, %230 : vector<16x16xf32>
    %232 = arith.truncf %231 : vector<16x16xf32> to vector<16x16xbf16>
    %233 = arith.truncf %217 : vector<16x16xf32> to vector<16x16xbf16>
    %cst_97 = arith.constant dense<0.000000e+00> : vector<16x16xf32>
    %234 = tpu.matmul %232, %233, %cst_97 {dimension_numbers = #tpu.dot_dimension_numbers<[1], [0], [0], [1], [0, 0, 1, 1], [], []>} : vector<16x16xbf16>, vector<16x16xbf16>, vector<16x16xf32> -> vector<16x16xf32>
    %235 = vector.extract_strided_slice %214 {offsets = [0, 16], sizes = [16, 16], strides = [1, 1]} : vector<16x192xf32> to vector<16x16xf32>
    %236 = vector.extract_strided_slice %214 {offsets = [0, 80], sizes = [16, 16], strides = [1, 1]} : vector<16x192xf32> to vector<16x16xf32>
    %237 = vector.extract_strided_slice %214 {offsets = [0, 144], sizes = [16, 16], strides = [1, 1]} : vector<16x192xf32> to vector<16x16xf32>
    %238 = arith.truncf %235 : vector<16x16xf32> to vector<16x16xbf16>
    %239 = arith.truncf %236 : vector<16x16xf32> to vector<16x16xbf16>
    %cst_98 = arith.constant dense<0.000000e+00> : vector<16x16xf32>
    %240 = tpu.matmul %238, %239, %cst_98 {dimension_numbers = #tpu.dot_dimension_numbers<[1], [1], [0], [0], [0, 0, 1, 0], [], []>} : vector<16x16xbf16>, vector<16x16xbf16>, vector<16x16xf32> -> vector<16x16xf32>
    %241 = arith.addf %240, %6 : vector<16x16xf32>
    %cst_99 = arith.constant dense<0xFF800000> : vector<16xf32>
    %242 = vector.multi_reduction <maximumf>, %241, %cst_99 [1] : vector<16x16xf32> to vector<16xf32>
    %243 = vector.shape_cast %242 : vector<16xf32> to vector<16x1xf32>
    %244 = vector.broadcast %243 : vector<16x1xf32> to vector<16x16xf32>
    %245 = arith.subf %241, %244 : vector<16x16xf32>
    %246 = math.exp %245 : vector<16x16xf32>
    %cst_100 = arith.constant dense<0.000000e+00> : vector<16xf32>
    %247 = vector.multi_reduction <add>, %246, %cst_100 [1] : vector<16x16xf32> to vector<16xf32>
    %248 = vector.shape_cast %247 : vector<16xf32> to vector<16x1xf32>
    %249 = tpu.reciprocal %248 {approx = true} : vector<16x1xf32> -> vector<16x1xf32>
    %250 = vector.broadcast %249 : vector<16x1xf32> to vector<16x16xf32>
    %251 = arith.mulf %246, %250 : vector<16x16xf32>
    %252 = arith.truncf %251 : vector<16x16xf32> to vector<16x16xbf16>
    %253 = arith.truncf %237 : vector<16x16xf32> to vector<16x16xbf16>
    %cst_101 = arith.constant dense<0.000000e+00> : vector<16x16xf32>
    %254 = tpu.matmul %252, %253, %cst_101 {dimension_numbers = #tpu.dot_dimension_numbers<[1], [0], [0], [1], [0, 0, 1, 1], [], []>} : vector<16x16xbf16>, vector<16x16xbf16>, vector<16x16xf32> -> vector<16x16xf32>
    %255 = vector.extract_strided_slice %214 {offsets = [0, 32], sizes = [16, 16], strides = [1, 1]} : vector<16x192xf32> to vector<16x16xf32>
    %256 = vector.extract_strided_slice %214 {offsets = [0, 96], sizes = [16, 16], strides = [1, 1]} : vector<16x192xf32> to vector<16x16xf32>
    %257 = vector.extract_strided_slice %214 {offsets = [0, 160], sizes = [16, 16], strides = [1, 1]} : vector<16x192xf32> to vector<16x16xf32>
    %258 = arith.truncf %255 : vector<16x16xf32> to vector<16x16xbf16>
    %259 = arith.truncf %256 : vector<16x16xf32> to vector<16x16xbf16>
    %cst_102 = arith.constant dense<0.000000e+00> : vector<16x16xf32>
    %260 = tpu.matmul %258, %259, %cst_102 {dimension_numbers = #tpu.dot_dimension_numbers<[1], [1], [0], [0], [0, 0, 1, 0], [], []>} : vector<16x16xbf16>, vector<16x16xbf16>, vector<16x16xf32> -> vector<16x16xf32>
    %261 = arith.addf %260, %6 : vector<16x16xf32>
    %cst_103 = arith.constant dense<0xFF800000> : vector<16xf32>
    %262 = vector.multi_reduction <maximumf>, %261, %cst_103 [1] : vector<16x16xf32> to vector<16xf32>
    %263 = vector.shape_cast %262 : vector<16xf32> to vector<16x1xf32>
    %264 = vector.broadcast %263 : vector<16x1xf32> to vector<16x16xf32>
    %265 = arith.subf %261, %264 : vector<16x16xf32>
    %266 = math.exp %265 : vector<16x16xf32>
    %cst_104 = arith.constant dense<0.000000e+00> : vector<16xf32>
    %267 = vector.multi_reduction <add>, %266, %cst_104 [1] : vector<16x16xf32> to vector<16xf32>
    %268 = vector.shape_cast %267 : vector<16xf32> to vector<16x1xf32>
    %269 = tpu.reciprocal %268 {approx = true} : vector<16x1xf32> -> vector<16x1xf32>
    %270 = vector.broadcast %269 : vector<16x1xf32> to vector<16x16xf32>
    %271 = arith.mulf %266, %270 : vector<16x16xf32>
    %272 = arith.truncf %271 : vector<16x16xf32> to vector<16x16xbf16>
    %273 = arith.truncf %257 : vector<16x16xf32> to vector<16x16xbf16>
    %cst_105 = arith.constant dense<0.000000e+00> : vector<16x16xf32>
    %274 = tpu.matmul %272, %273, %cst_105 {dimension_numbers = #tpu.dot_dimension_numbers<[1], [0], [0], [1], [0, 0, 1, 1], [], []>} : vector<16x16xbf16>, vector<16x16xbf16>, vector<16x16xf32> -> vector<16x16xf32>
    %275 = vector.extract_strided_slice %214 {offsets = [0, 48], sizes = [16, 16], strides = [1, 1]} : vector<16x192xf32> to vector<16x16xf32>
    %276 = vector.extract_strided_slice %214 {offsets = [0, 112], sizes = [16, 16], strides = [1, 1]} : vector<16x192xf32> to vector<16x16xf32>
    %277 = vector.extract_strided_slice %214 {offsets = [0, 176], sizes = [16, 16], strides = [1, 1]} : vector<16x192xf32> to vector<16x16xf32>
    %278 = arith.truncf %275 : vector<16x16xf32> to vector<16x16xbf16>
    %279 = arith.truncf %276 : vector<16x16xf32> to vector<16x16xbf16>
    %cst_106 = arith.constant dense<0.000000e+00> : vector<16x16xf32>
    %280 = tpu.matmul %278, %279, %cst_106 {dimension_numbers = #tpu.dot_dimension_numbers<[1], [1], [0], [0], [0, 0, 1, 0], [], []>} : vector<16x16xbf16>, vector<16x16xbf16>, vector<16x16xf32> -> vector<16x16xf32>
    %281 = arith.addf %280, %6 : vector<16x16xf32>
    %cst_107 = arith.constant dense<0xFF800000> : vector<16xf32>
    %282 = vector.multi_reduction <maximumf>, %281, %cst_107 [1] : vector<16x16xf32> to vector<16xf32>
    %283 = vector.shape_cast %282 : vector<16xf32> to vector<16x1xf32>
    %284 = vector.broadcast %283 : vector<16x1xf32> to vector<16x16xf32>
    %285 = arith.subf %281, %284 : vector<16x16xf32>
    %286 = math.exp %285 : vector<16x16xf32>
    %cst_108 = arith.constant dense<0.000000e+00> : vector<16xf32>
    %287 = vector.multi_reduction <add>, %286, %cst_108 [1] : vector<16x16xf32> to vector<16xf32>
    %288 = vector.shape_cast %287 : vector<16xf32> to vector<16x1xf32>
    %289 = tpu.reciprocal %288 {approx = true} : vector<16x1xf32> -> vector<16x1xf32>
    %290 = vector.broadcast %289 : vector<16x1xf32> to vector<16x16xf32>
    %291 = arith.mulf %286, %290 : vector<16x16xf32>
    %292 = arith.truncf %291 : vector<16x16xf32> to vector<16x16xbf16>
    %293 = arith.truncf %277 : vector<16x16xf32> to vector<16x16xbf16>
    %cst_109 = arith.constant dense<0.000000e+00> : vector<16x16xf32>
    %294 = tpu.matmul %292, %293, %cst_109 {dimension_numbers = #tpu.dot_dimension_numbers<[1], [0], [0], [1], [0, 0, 1, 1], [], []>} : vector<16x16xbf16>, vector<16x16xbf16>, vector<16x16xf32> -> vector<16x16xf32>
    %295 = tpu.concatenate %234, %254, %274, %294 in 1 : vector<16x16xf32>, vector<16x16xf32>, vector<16x16xf32>, vector<16x16xf32> -> vector<16x64xf32>
    %c1_110 = arith.constant 1 : index
    %c0_111 = arith.constant 0 : index
    %c0_112 = arith.constant 0 : index
    %296 = vector.load %arg9[%c1_110, %c0_111, %c0_112] : memref<2x64x64xbf16, #tpu.memory_space<vmem>>, vector<1x64x64xbf16>
    %297 = vector.shape_cast %296 : vector<1x64x64xbf16> to vector<64x64xbf16>
    %298 = arith.truncf %295 : vector<16x64xf32> to vector<16x64xbf16>
    %cst_113 = arith.constant dense<0.000000e+00> : vector<16x64xf32>
    %299 = tpu.matmul %298, %297, %cst_113 {dimension_numbers = #tpu.dot_dimension_numbers<[1], [0], [0], [1], [0, 0, 1, 1], [], []>} : vector<16x64xbf16>, vector<64x64xbf16>, vector<16x64xf32> -> vector<16x64xf32>
    %300 = arith.addf %182, %299 : vector<16x64xf32>
    %c1_114 = arith.constant 1 : index
    %c0_115 = arith.constant 0 : index
    %c0_116 = arith.constant 0 : index
    %301 = vector.load %arg10[%c1_114, %c0_115, %c0_116] : memref<2x1x64xf32, #tpu.memory_space<vmem>>, vector<1x1x64xf32>
    %302 = vector.shape_cast %301 : vector<1x1x64xf32> to vector<1x64xf32>
    %303 = vector.broadcast %302 : vector<1x64xf32> to vector<16x64xf32>
    %304 = arith.addf %300, %303 : vector<16x64xf32>
    %c1_117 = arith.constant 1 : index
    %c0_118 = arith.constant 0 : index
    %c0_119 = arith.constant 0 : index
    %305 = vector.load %arg11[%c1_117, %c0_118, %c0_119] : memref<2x1x64xf32, #tpu.memory_space<vmem>>, vector<1x1x64xf32>
    %306 = vector.shape_cast %305 : vector<1x1x64xf32> to vector<1x64xf32>
    %c1_120 = arith.constant 1 : index
    %c0_121 = arith.constant 0 : index
    %c0_122 = arith.constant 0 : index
    %307 = vector.load %arg12[%c1_120, %c0_121, %c0_122] : memref<2x1x64xf32, #tpu.memory_space<vmem>>, vector<1x1x64xf32>
    %308 = vector.shape_cast %307 : vector<1x1x64xf32> to vector<1x64xf32>
    %cst_123 = arith.constant dense<0.000000e+00> : vector<16xf32>
    %309 = vector.multi_reduction <add>, %304, %cst_123 [1] : vector<16x64xf32> to vector<16xf32>
    %310 = vector.shape_cast %309 : vector<16xf32> to vector<16x1xf32>
    %cst_124 = arith.constant 6.400000e+01 : f32
    %311 = vector.broadcast %cst_124 : f32 to vector<16x1xf32>
    %312 = arith.divf %310, %311 : vector<16x1xf32>
    %313 = vector.broadcast %312 : vector<16x1xf32> to vector<16x64xf32>
    %314 = arith.subf %304, %313 : vector<16x64xf32>
    %315 = arith.mulf %314, %314 : vector<16x64xf32>
    %cst_125 = arith.constant dense<0.000000e+00> : vector<16xf32>
    %316 = vector.multi_reduction <add>, %315, %cst_125 [1] : vector<16x64xf32> to vector<16xf32>
    %317 = vector.shape_cast %316 : vector<16xf32> to vector<16x1xf32>
    %cst_126 = arith.constant 6.400000e+01 : f32
    %318 = vector.broadcast %cst_126 : f32 to vector<16x1xf32>
    %319 = arith.divf %317, %318 : vector<16x1xf32>
    %cst_127 = arith.constant 9.99999997E-7 : f32
    %320 = vector.broadcast %cst_127 : f32 to vector<16x1xf32>
    %321 = arith.addf %319, %320 : vector<16x1xf32>
    %322 = math.rsqrt %321 : vector<16x1xf32>
    %323 = vector.broadcast %322 : vector<16x1xf32> to vector<16x64xf32>
    %324 = arith.mulf %314, %323 : vector<16x64xf32>
    %325 = vector.broadcast %306 : vector<1x64xf32> to vector<16x64xf32>
    %326 = arith.mulf %324, %325 : vector<16x64xf32>
    %327 = vector.broadcast %308 : vector<1x64xf32> to vector<16x64xf32>
    %328 = arith.addf %326, %327 : vector<16x64xf32>
    %c1_128 = arith.constant 1 : index
    %c0_129 = arith.constant 0 : index
    %c0_130 = arith.constant 0 : index
    %329 = vector.load %arg13[%c1_128, %c0_129, %c0_130] : memref<2x64x256xbf16, #tpu.memory_space<vmem>>, vector<1x64x256xbf16>
    %330 = vector.shape_cast %329 : vector<1x64x256xbf16> to vector<64x256xbf16>
    %331 = arith.truncf %328 : vector<16x64xf32> to vector<16x64xbf16>
    %cst_131 = arith.constant dense<0.000000e+00> : vector<16x256xf32>
    %332 = tpu.matmul %331, %330, %cst_131 {dimension_numbers = #tpu.dot_dimension_numbers<[1], [0], [0], [1], [0, 0, 1, 1], [], []>} : vector<16x64xbf16>, vector<64x256xbf16>, vector<16x256xf32> -> vector<16x256xf32>
    %c1_132 = arith.constant 1 : index
    %c0_133 = arith.constant 0 : index
    %c0_134 = arith.constant 0 : index
    %333 = vector.load %arg14[%c1_132, %c0_133, %c0_134] : memref<2x1x256xf32, #tpu.memory_space<vmem>>, vector<1x1x256xf32>
    %334 = vector.shape_cast %333 : vector<1x1x256xf32> to vector<1x256xf32>
    %335 = vector.broadcast %334 : vector<1x256xf32> to vector<16x256xf32>
    %336 = arith.addf %332, %335 : vector<16x256xf32>
    %cst_135 = arith.constant 5.000000e-01 : f32
    %337 = vector.broadcast %cst_135 : f32 to vector<16x256xf32>
    %338 = arith.mulf %337, %336 : vector<16x256xf32>
    %cst_136 = arith.constant 4.471500e-02 : f32
    %339 = vector.broadcast %cst_136 : f32 to vector<16x256xf32>
    %340 = arith.mulf %339, %336 : vector<16x256xf32>
    %341 = arith.mulf %340, %336 : vector<16x256xf32>
    %342 = arith.mulf %341, %336 : vector<16x256xf32>
    %343 = arith.addf %336, %342 : vector<16x256xf32>
    %cst_137 = arith.constant 0.797884583 : f32
    %344 = vector.broadcast %cst_137 : f32 to vector<16x256xf32>
    %345 = arith.mulf %344, %343 : vector<16x256xf32>
    %346 = math.tanh %345 : vector<16x256xf32>
    %cst_138 = arith.constant 1.000000e+00 : f32
    %347 = vector.broadcast %cst_138 : f32 to vector<16x256xf32>
    %348 = arith.addf %347, %346 : vector<16x256xf32>
    %349 = arith.mulf %338, %348 : vector<16x256xf32>
    %c1_139 = arith.constant 1 : index
    %c0_140 = arith.constant 0 : index
    %c0_141 = arith.constant 0 : index
    %350 = vector.load %arg15[%c1_139, %c0_140, %c0_141] : memref<2x256x64xbf16, #tpu.memory_space<vmem>>, vector<1x256x64xbf16>
    %351 = vector.shape_cast %350 : vector<1x256x64xbf16> to vector<256x64xbf16>
    %352 = arith.truncf %349 : vector<16x256xf32> to vector<16x256xbf16>
    %cst_142 = arith.constant dense<0.000000e+00> : vector<16x64xf32>
    %353 = tpu.matmul %352, %351, %cst_142 {dimension_numbers = #tpu.dot_dimension_numbers<[1], [0], [0], [1], [0, 0, 1, 1], [], []>} : vector<16x256xbf16>, vector<256x64xbf16>, vector<16x64xf32> -> vector<16x64xf32>
    %354 = arith.addf %304, %353 : vector<16x64xf32>
    %c1_143 = arith.constant 1 : index
    %c0_144 = arith.constant 0 : index
    %c0_145 = arith.constant 0 : index
    %355 = vector.load %arg16[%c1_143, %c0_144, %c0_145] : memref<2x1x64xf32, #tpu.memory_space<vmem>>, vector<1x1x64xf32>
    %356 = vector.shape_cast %355 : vector<1x1x64xf32> to vector<1x64xf32>
    %357 = vector.broadcast %356 : vector<1x64xf32> to vector<16x64xf32>
    %358 = arith.addf %354, %357 : vector<16x64xf32>
    %c0_146 = arith.constant 0 : index
    %c0_147 = arith.constant 0 : index
    %359 = vector.load %arg17[%c0_146, %c0_147] : memref<1x64xf32, #tpu.memory_space<vmem>>, vector<1x64xf32>
    %c0_148 = arith.constant 0 : index
    %c0_149 = arith.constant 0 : index
    %360 = vector.load %arg18[%c0_148, %c0_149] : memref<1x64xf32, #tpu.memory_space<vmem>>, vector<1x64xf32>
    %cst_150 = arith.constant dense<0.000000e+00> : vector<16xf32>
    %361 = vector.multi_reduction <add>, %358, %cst_150 [1] : vector<16x64xf32> to vector<16xf32>
    %362 = vector.shape_cast %361 : vector<16xf32> to vector<16x1xf32>
    %cst_151 = arith.constant 6.400000e+01 : f32
    %363 = vector.broadcast %cst_151 : f32 to vector<16x1xf32>
    %364 = arith.divf %362, %363 : vector<16x1xf32>
    %365 = vector.broadcast %364 : vector<16x1xf32> to vector<16x64xf32>
    %366 = arith.subf %358, %365 : vector<16x64xf32>
    %367 = arith.mulf %366, %366 : vector<16x64xf32>
    %cst_152 = arith.constant dense<0.000000e+00> : vector<16xf32>
    %368 = vector.multi_reduction <add>, %367, %cst_152 [1] : vector<16x64xf32> to vector<16xf32>
    %369 = vector.shape_cast %368 : vector<16xf32> to vector<16x1xf32>
    %cst_153 = arith.constant 6.400000e+01 : f32
    %370 = vector.broadcast %cst_153 : f32 to vector<16x1xf32>
    %371 = arith.divf %369, %370 : vector<16x1xf32>
    %cst_154 = arith.constant 9.99999997E-7 : f32
    %372 = vector.broadcast %cst_154 : f32 to vector<16x1xf32>
    %373 = arith.addf %371, %372 : vector<16x1xf32>
    %374 = math.rsqrt %373 : vector<16x1xf32>
    %375 = vector.broadcast %374 : vector<16x1xf32> to vector<16x64xf32>
    %376 = arith.mulf %366, %375 : vector<16x64xf32>
    %377 = vector.broadcast %359 : vector<1x64xf32> to vector<16x64xf32>
    %378 = arith.mulf %376, %377 : vector<16x64xf32>
    %379 = vector.broadcast %360 : vector<1x64xf32> to vector<16x64xf32>
    %380 = arith.addf %378, %379 : vector<16x64xf32>
    %381 = vector.extract_strided_slice %380 {offsets = [0, 0], sizes = [1, 64], strides = [1, 1]} : vector<16x64xf32> to vector<1x64xf32>
    %382 = vector.extract_strided_slice %380 {offsets = [1, 0], sizes = [1, 64], strides = [1, 1]} : vector<16x64xf32> to vector<1x64xf32>
    %383 = arith.addf %381, %382 : vector<1x64xf32>
    %cst_155 = arith.constant 5.000000e-01 : f32
    %384 = vector.broadcast %cst_155 : f32 to vector<1x64xf32>
    %385 = arith.mulf %383, %384 : vector<1x64xf32>
    %386 = vector.extract_strided_slice %380 {offsets = [8, 0], sizes = [1, 64], strides = [1, 1]} : vector<16x64xf32> to vector<1x64xf32>
    %387 = vector.extract_strided_slice %380 {offsets = [9, 0], sizes = [1, 64], strides = [1, 1]} : vector<16x64xf32> to vector<1x64xf32>
    %388 = arith.addf %386, %387 : vector<1x64xf32>
    %cst_156 = arith.constant 5.000000e-01 : f32
    %389 = vector.broadcast %cst_156 : f32 to vector<1x64xf32>
    %390 = arith.mulf %388, %389 : vector<1x64xf32>
    %391 = tpu.concatenate %385, %390 in 0 : vector<1x64xf32>, vector<1x64xf32> -> vector<2x64xf32>
    %c0_157 = arith.constant 0 : index
    %c0_158 = arith.constant 0 : index
    %392 = vector.load %arg19[%c0_157, %c0_158] : memref<1x64xf32, #tpu.memory_space<vmem>>, vector<1x64xf32>
    %c0_159 = arith.constant 0 : index
    %c0_160 = arith.constant 0 : index
    %393 = vector.load %arg20[%c0_159, %c0_160] : memref<1x64xf32, #tpu.memory_space<vmem>>, vector<1x64xf32>
    %cst_161 = arith.constant dense<0.000000e+00> : vector<2xf32>
    %394 = vector.multi_reduction <add>, %391, %cst_161 [1] : vector<2x64xf32> to vector<2xf32>
    %395 = vector.shape_cast %394 : vector<2xf32> to vector<2x1xf32>
    %cst_162 = arith.constant 6.400000e+01 : f32
    %396 = vector.broadcast %cst_162 : f32 to vector<2x1xf32>
    %397 = arith.divf %395, %396 : vector<2x1xf32>
    %398 = vector.broadcast %397 : vector<2x1xf32> to vector<2x64xf32>
    %399 = arith.subf %391, %398 : vector<2x64xf32>
    %400 = arith.mulf %399, %399 : vector<2x64xf32>
    %cst_163 = arith.constant dense<0.000000e+00> : vector<2xf32>
    %401 = vector.multi_reduction <add>, %400, %cst_163 [1] : vector<2x64xf32> to vector<2xf32>
    %402 = vector.shape_cast %401 : vector<2xf32> to vector<2x1xf32>
    %cst_164 = arith.constant 6.400000e+01 : f32
    %403 = vector.broadcast %cst_164 : f32 to vector<2x1xf32>
    %404 = arith.divf %402, %403 : vector<2x1xf32>
    %cst_165 = arith.constant 9.99999974E-6 : f32
    %405 = vector.broadcast %cst_165 : f32 to vector<2x1xf32>
    %406 = arith.addf %404, %405 : vector<2x1xf32>
    %407 = math.rsqrt %406 : vector<2x1xf32>
    %408 = vector.broadcast %407 : vector<2x1xf32> to vector<2x64xf32>
    %409 = arith.mulf %399, %408 : vector<2x64xf32>
    %410 = vector.broadcast %392 : vector<1x64xf32> to vector<2x64xf32>
    %411 = arith.mulf %409, %410 : vector<2x64xf32>
    %412 = vector.broadcast %393 : vector<1x64xf32> to vector<2x64xf32>
    %413 = arith.addf %411, %412 : vector<2x64xf32>
    %c0_166 = arith.constant 0 : index
    %c0_167 = arith.constant 0 : index
    %414 = vector.load %arg21[%c0_166, %c0_167] : memref<64x128xbf16, #tpu.memory_space<vmem>>, vector<64x128xbf16>
    %415 = arith.truncf %413 : vector<2x64xf32> to vector<2x64xbf16>
    %cst_168 = arith.constant dense<0.000000e+00> : vector<2x128xf32>
    %416 = tpu.matmul %415, %414, %cst_168 {dimension_numbers = #tpu.dot_dimension_numbers<[1], [0], [0], [1], [0, 0, 1, 1], [], []>} : vector<2x64xbf16>, vector<64x128xbf16>, vector<2x128xf32> -> vector<2x128xf32>
    %c0_169 = arith.constant 0 : index
    %c0_170 = arith.constant 0 : index
    %417 = vector.load %arg22[%c0_169, %c0_170] : memref<1x128xf32, #tpu.memory_space<vmem>>, vector<1x128xf32>
    %418 = vector.broadcast %417 : vector<1x128xf32> to vector<2x128xf32>
    %419 = arith.addf %416, %418 : vector<2x128xf32>
    %c0_171 = arith.constant 0 : index
    %c0_172 = arith.constant 0 : index
    %420 = vector.load %arg23[%c0_171, %c0_172] : memref<2x128xf32, #tpu.memory_space<vmem>>, vector<2x128xf32>
    tpu.vector_store %arg23[%c0_171, %c0_172], %419 {strides = array<i32>} : memref<2x128xf32, #tpu.memory_space<vmem>>, vector<2x128xf32>,
    return
  }
  func.func @transform_0(%arg0: i32) -> (i32, i32) {
    %c0_i32 = arith.constant 0 : i32
    %c0_i32_0 = arith.constant 0 : i32
    %c0_i32_1 = arith.constant 0 : i32
    return %c0_i32, %c0_i32_0 : i32, i32
  }
  func.func @transform_1(%arg0: i32) -> (i32, i32) {
    %c0_i32 = arith.constant 0 : i32
    %c0_i32_0 = arith.constant 0 : i32
    %c0_i32_1 = arith.constant 0 : i32
    return %c0_i32, %c0_i32_0 : i32, i32
  }
  func.func @transform_2(%arg0: i32) -> (i32, i32) {
    %c0_i32 = arith.constant 0 : i32
    %c0_i32_0 = arith.constant 0 : i32
    %c0_i32_1 = arith.constant 0 : i32
    return %c0_i32, %c0_i32_0 : i32, i32
  }
  func.func @transform_3(%arg0: i32) -> (i32, i32) {
    %c0_i32 = arith.constant 0 : i32
    %c0_i32_0 = arith.constant 0 : i32
    %c0_i32_1 = arith.constant 0 : i32
    return %c0_i32, %c0_i32_0 : i32, i32
  }
  func.func @transform_4(%arg0: i32) -> (i32, i32, i32) {
    %c0_i32 = arith.constant 0 : i32
    %c0_i32_0 = arith.constant 0 : i32
    %c0_i32_1 = arith.constant 0 : i32
    %c0_i32_2 = arith.constant 0 : i32
    return %c0_i32, %c0_i32_0, %c0_i32_1 : i32, i32, i32
  }
  func.func @transform_5(%arg0: i32) -> (i32, i32, i32) {
    %c0_i32 = arith.constant 0 : i32
    %c0_i32_0 = arith.constant 0 : i32
    %c0_i32_1 = arith.constant 0 : i32
    %c0_i32_2 = arith.constant 0 : i32
    return %c0_i32, %c0_i32_0, %c0_i32_1 : i32, i32, i32
  }
  func.func @transform_6(%arg0: i32) -> (i32, i32, i32) {
    %c0_i32 = arith.constant 0 : i32
    %c0_i32_0 = arith.constant 0 : i32
    %c0_i32_1 = arith.constant 0 : i32
    %c0_i32_2 = arith.constant 0 : i32
    return %c0_i32, %c0_i32_0, %c0_i32_1 : i32, i32, i32
  }
  func.func @transform_7(%arg0: i32) -> (i32, i32, i32) {
    %c0_i32 = arith.constant 0 : i32
    %c0_i32_0 = arith.constant 0 : i32
    %c0_i32_1 = arith.constant 0 : i32
    %c0_i32_2 = arith.constant 0 : i32
    return %c0_i32, %c0_i32_0, %c0_i32_1 : i32, i32, i32
  }
  func.func @transform_8(%arg0: i32) -> (i32, i32, i32) {
    %c0_i32 = arith.constant 0 : i32
    %c0_i32_0 = arith.constant 0 : i32
    %c0_i32_1 = arith.constant 0 : i32
    %c0_i32_2 = arith.constant 0 : i32
    return %c0_i32, %c0_i32_0, %c0_i32_1 : i32, i32, i32
  }
  func.func @transform_9(%arg0: i32) -> (i32, i32, i32) {
    %c0_i32 = arith.constant 0 : i32
    %c0_i32_0 = arith.constant 0 : i32
    %c0_i32_1 = arith.constant 0 : i32
    %c0_i32_2 = arith.constant 0 : i32
    return %c0_i32, %c0_i32_0, %c0_i32_1 : i32, i32, i32
  }
  func.func @transform_10(%arg0: i32) -> (i32, i32, i32) {
    %c0_i32 = arith.constant 0 : i32
    %c0_i32_0 = arith.constant 0 : i32
    %c0_i32_1 = arith.constant 0 : i32
    %c0_i32_2 = arith.constant 0 : i32
    return %c0_i32, %c0_i32_0, %c0_i32_1 : i32, i32, i32
  }
  func.func @transform_11(%arg0: i32) -> (i32, i32, i32) {
    %c0_i32 = arith.constant 0 : i32
    %c0_i32_0 = arith.constant 0 : i32
    %c0_i32_1 = arith.constant 0 : i32
    %c0_i32_2 = arith.constant 0 : i32
    return %c0_i32, %c0_i32_0, %c0_i32_1 : i32, i32, i32
  }
  func.func @transform_12(%arg0: i32) -> (i32, i32, i32) {
    %c0_i32 = arith.constant 0 : i32
    %c0_i32_0 = arith.constant 0 : i32
    %c0_i32_1 = arith.constant 0 : i32
    %c0_i32_2 = arith.constant 0 : i32
    return %c0_i32, %c0_i32_0, %c0_i32_1 : i32, i32, i32
  }
  func.func @transform_13(%arg0: i32) -> (i32, i32, i32) {
    %c0_i32 = arith.constant 0 : i32
    %c0_i32_0 = arith.constant 0 : i32
    %c0_i32_1 = arith.constant 0 : i32
    %c0_i32_2 = arith.constant 0 : i32
    return %c0_i32, %c0_i32_0, %c0_i32_1 : i32, i32, i32
  }
  func.func @transform_14(%arg0: i32) -> (i32, i32, i32) {
    %c0_i32 = arith.constant 0 : i32
    %c0_i32_0 = arith.constant 0 : i32
    %c0_i32_1 = arith.constant 0 : i32
    %c0_i32_2 = arith.constant 0 : i32
    return %c0_i32, %c0_i32_0, %c0_i32_1 : i32, i32, i32
  }
  func.func @transform_15(%arg0: i32) -> (i32, i32, i32) {
    %c0_i32 = arith.constant 0 : i32
    %c0_i32_0 = arith.constant 0 : i32
    %c0_i32_1 = arith.constant 0 : i32
    %c0_i32_2 = arith.constant 0 : i32
    return %c0_i32, %c0_i32_0, %c0_i32_1 : i32, i32, i32
  }
  func.func @transform_16(%arg0: i32) -> (i32, i32) {
    %c0_i32 = arith.constant 0 : i32
    %c0_i32_0 = arith.constant 0 : i32
    %c0_i32_1 = arith.constant 0 : i32
    return %c0_i32, %c0_i32_0 : i32, i32
  }
  func.func @transform_17(%arg0: i32) -> (i32, i32) {
    %c0_i32 = arith.constant 0 : i32
    %c0_i32_0 = arith.constant 0 : i32
    %c0_i32_1 = arith.constant 0 : i32
    return %c0_i32, %c0_i32_0 : i32, i32
  }
  func.func @transform_18(%arg0: i32) -> (i32, i32) {
    %c0_i32 = arith.constant 0 : i32
    %c0_i32_0 = arith.constant 0 : i32
    %c0_i32_1 = arith.constant 0 : i32
    return %c0_i32, %c0_i32_0 : i32, i32
  }
  func.func @transform_19(%arg0: i32) -> (i32, i32) {
    %c0_i32 = arith.constant 0 : i32
    %c0_i32_0 = arith.constant 0 : i32
    %c0_i32_1 = arith.constant 0 : i32
    return %c0_i32, %c0_i32_0 : i32, i32
  }
  func.func @transform_20(%arg0: i32) -> (i32, i32) {
    %c0_i32 = arith.constant 0 : i32
    %c0_i32_0 = arith.constant 0 : i32
    %c0_i32_1 = arith.constant 0 : i32
    return %c0_i32, %c0_i32_0 : i32, i32
  }
  func.func @transform_21(%arg0: i32) -> (i32, i32) {
    %c0_i32 = arith.constant 0 : i32
    %c0_i32_0 = arith.constant 0 : i32
    %c0_i32_1 = arith.constant 0 : i32
    return %c0_i32, %c0_i32_0 : i32, i32
  }
  func.func @transform_22(%arg0: i32) -> (i32, i32) {
    %c0_i32 = arith.constant 0 : i32
    %c0_i32_0 = arith.constant 0 : i32
    %c0_i32_1 = arith.constant 0 : i32
    return %c0_i32, %c0_i32_0 : i32, i32
  }
}

</mosaic_0001>

<bundles_post_ra>
// kernel: ast_forward.1
= control target key start
LH: loop header
LB: loop body
LE: loop exit
PB: predicated region body
PF: predicated region fallthrough
CT: control target
= control target key end

     0   :  { %s3707_s0 = inlined_call_operand.vmem [shape: f32[16,256], index: 0, kind: input, shape index: {}]   ;;  %s3708_s1 = inlined_call_operand.vmem [shape: f32[16,16], index: 1, kind: input, shape index: {}]   ;;  %s3709_s2 = inlined_call_operand.vmem [shape: bf16[256,64], index: 2, kind: input, shape index: {}]   ;;  %s3710_s3 = inlined_call_operand.vmem [shape: f32[16,64], index: 3, kind: input, shape index: {}]   ;;  %s3711_s4 = inlined_call_operand.vmem [shape: f32[2,1,64], index: 4, kind: input, shape index: {}]   ;;  %s3712_s5 = inlined_call_operand.vmem [shape: f32[2,1,64], index: 5, kind: input, shape index: {}]   ;;  %s3713_s6 = inlined_call_operand.vmem [shape: bf16[2,64,192], index: 6, kind: input, shape index: {}]   ;;  %s3714_s7 = inlined_call_operand.vmem [shape: f32[2,1,192], index: 7, kind: input, shape index: {}]   ;;  %s3715_s8 = inlined_call_operand.vmem [shape: bf16[2,64,64], index: 8, kind: input, shape index: {}]   ;;  %s3716_s9 = inlined_call_operand.vmem [shape: f32[2,1,64], index: 9, kind: input, shape index: {}]   ;;  %s3717_s10 = inlined_call_operand.vmem [shape: f32[2,1,64], index: 10, kind: input, shape index: {}]   ;;  %s3718_s11 = inlined_call_operand.vmem [shape: f32[2,1,64], index: 11, kind: input, shape index: {}]   ;;  %s3719_s12 = inlined_call_operand.vmem [shape: bf16[2,64,256], index: 12, kind: input, shape index: {}]   ;;  %s3720_s13 = inlined_call_operand.vmem [shape: f32[2,1,256], index: 13, kind: input, shape index: {}]   ;;  %s3721_s14 = inlined_call_operand.vmem [shape: bf16[2,256,64], index: 14, kind: input, shape index: {}]   ;;  %s3722_s15 = inlined_call_operand.vmem [shape: f32[2,1,64], index: 15, kind: input, shape index: {}]   ;;  %s3723_s16 = inlined_call_operand.vmem [shape: f32[1,64], index: 16, kind: input, shape index: {}]   ;;  %s3724_s17 = inlined_call_operand.vmem [shape: f32[1,64], index: 17, kind: input, shape index: {}]   ;;  %s3725_s18 = inlined_call_operand.vmem [shape: f32[1,64], index: 18, kind: input, shape index: {}]   ;;  %s3726_s19 = inlined_call_operand.vmem [shape: f32[1,64], index: 19, kind: input, shape index: {}]   ;;  %s3727_s20 = inlined_call_operand.vmem [shape: bf16[64,128], index: 20, kind: input, shape index: {}]   ;;  %s3728_s21 = inlined_call_operand.vmem [shape: f32[1,128], index: 21, kind: input, shape index: {}]   ;;  %s3729_s22 = inlined_call_operand.hbm [shape: f32[2,128], index: 22, kind: output, shape index: {}]  }
   0x1   :  { %3748 = sst [smem:[#allocation5_spill]] %s3707_s0 }
   0x2   :  { %3749 = sst [smem:[#allocation6_spill]] %s3708_s1 }
   0x3   :  { %3750 = sst [smem:[#allocation7_spill]] %s3709_s2 }
   0x4   :  { %3751 = sst [smem:[#allocation8_spill]] %s3710_s3 }
   0x5   :  { %3752 = sst [smem:[#allocation9_spill]] %s3711_s4 }
   0x6   :  { %3753 = sst [smem:[#allocation10_spill]] %s3712_s5 }
   0x7   :  { %3754 = sst [smem:[#allocation11_spill]] %s3713_s6 }
   0x8   :  { %s3755_s29 = sld [smem:[#allocation7_spill]] }
   0xe   :  { %v2584_v0 = vld [vmem:[%s3755_s29 + $0x38] sm:$0xff]  ;;  %v2583_v2 = vld [vmem:[%s3755_s29 + $0x30] sm:$0xff]  ;;  %v2582_v4 = vld [vmem:[%s3755_s29 + $0x28] sm:$0xff] }
   0xf   :  { %v2592_v1 = vld [vmem:[%s3755_s29 + $0x78] sm:$0xff]  ;;  %209 = vmatpush.bf16.msra.mxu0 %v2584_v0  ;;  %v2591_v3 = vld [vmem:[%s3755_s29 + $0x70] sm:$0xff]  ;;  %v2590_v5 = vld [vmem:[%s3755_s29 + $0x68] sm:$0xff] }
  0x10   :  { %223 = vmatpush.bf16.msra.mxu1 %v2592_v1  ;;  %v2581_v6 = vld [vmem:[%s3755_s29 + $0x20] sm:$0xff] }
  0x11   :  { %v2589_v7 = vld [vmem:[%s3755_s29 + $0x60] sm:$0xff] }
  0x13   :  { %210 = vmatpush.bf16.msra.mxu0 %v2583_v2 }
  0x14   :  { %224 = vmatpush.bf16.msra.mxu1 %v2591_v3 }
  0x17   :  { %211 = vmatpush.bf16.msra.mxu0 %v2582_v4 }
  0x18   :  { %225 = vmatpush.bf16.msra.mxu1 %v2590_v5 }
  0x19   :  { %27 = vsyncpa [#allocation3], 0  ;;  %v2580_v8 = vld [vmem:[%s3755_s29 + $0x18] sm:$0xff]  ;;  %v2579_v10 = vld [vmem:[%s3755_s29 + $0x10] sm:$0xff]  ;;  %s3756_s1 = sld [smem:[#allocation5_spill]]  ;;  %vm241_vm0 = vcmask 523264  }
  0x1a   :  { %v2588_v9 = vld [vmem:[%s3755_s29 + $0x58] sm:$0xff]  ;;  %v2587_v11 = vld [vmem:[%s3755_s29 + $0x50] sm:$0xff]  ;;  %v2578_v12 = vld [vmem:[%s3755_s29 + $0x8] sm:$0xff]  ;;  %s3757_s3 = sld [smem:[#allocation8_spill]]  ;;  %v2857_v34 = vmov 64.0   ;;  %s2858_s28 = smov 112  }
  0x1b   :  { %212 = vmatpush.bf16.msra.mxu0 %v2581_v6  ;;  %v2586_v13 = vld [vmem:[%s3755_s29 + $0x48] sm:$0xff]  ;;  %v2577_v14 = vld [vmem:[%s3755_s29] sm:$0xff]  ;;  %2725 = vrcp.f32 %v2857_v34  ;;  %s3758_s23 = sld [smem:[#allocation11_spill]]  ;;  %s3741_s30 = smov 32   ;;  %vm393_vm8 = vcmask 130048   ;;  %vm683_vm9 = vcmask 261120  }
  0x1c   :  { %226 = vmatpush.bf16.msra.mxu1 %v2589_v7  ;;  %v2585_v15 = vld [vmem:[%s3755_s29 + $0x40] sm:$0xff]  ;;  %s3759_s25 = sld [smem:[#allocation9_spill]]  ;;  %s3745_s4 = smov 64   ;;  %vm686_vm10 = vcmask 392192  }
  0x1d   :  { %s3760_s29 = sld [smem:[#allocation10_spill]]  ;;  %s3746_s0 = smov 48  }
  0x1e   :  { %s3743_s5 = smov 16   ;;  %s3737_s24 = smov 80  }
  0x1f   :  { %213 = vmatpush.bf16.msra.mxu0 %v2580_v8  ;;  %v73_v16 = vld [vmem:[%s3756_s1] sm:$0xff]  ;;  %v75_v17 = vld [vmem:[%s3756_s1 + $0x10] sm:$0xff]  ;;  %v74_v18 = vld [vmem:[%s3756_s1 + $0x8] sm:$0xff]  ;;  %s3761_s2 = sld [smem:[#allocation6_spill]] }
  0x20   :  { %227 = vmatpush.bf16.msra.mxu1 %v2588_v9  ;;  %v76_v19 = vld [vmem:[%s3756_s1 + $0x18] sm:$0xff]  ;;  %v109_v20 = vpack.c.bf16 %v75_v17, %v73_v16  ;;  %v111_v22 = vld [vmem:[%s3757_s3] sm:$0xff]  ;;  %v112_v28 = vld [vmem:[%s3757_s3 + $0x8] sm:$0xff]  ;;  %s3739_s1 = smov 96  }
  0x21   :  { %v110_v21 = vpack.c.bf16 %v76_v19, %v74_v18  ;;  %v2726_v35 = vpop.eup %2725  ;;  %v2208_v51 = vld [vmem:[%s3758_s23 + $0x30] sm:$0xf]  ;;  %v2600_v52 = vld [vmem:[%s3758_s23 + $0x34] sm:$0xf0]  ;;  %v2599_v53 = vld [vmem:[%s3758_s23 + $0x34] sm:$0xf] }
  0x22   :  { %v249_v36 = vmul.f32 64.0, %v2726_v35  ;;  %vm253_vm1 = vweird.f32 %v2726_v35  ;;  %v2209_v54 = vor.u32 %v2600_v52, %v2208_v51  ;;  %v2210_v55 = vld [vmem:[%s3758_s23 + $0x38] sm:$0xf0]  ;;  %v2200_v57 = vld [vmem:[%s3758_s23 + $0x20] sm:$0xf] }
  0x23   :  { %214 = vmatpush.bf16.msra.mxu0 %v2579_v10  ;;  %v2213_v56 = vor.u32 %v2599_v53, %v2210_v55  ;;  %v2598_v58 = vld [vmem:[%s3758_s23 + $0x24] sm:$0xf0]  ;;  %v2597_v59 = vld [vmem:[%s3758_s23 + $0x24] sm:$0xf]  ;;  %v2202_v61 = vld [vmem:[%s3758_s23 + $0x28] sm:$0xf0] }
  0x24   :  { %228 = vmatpush.bf16.msra.mxu1 %v2587_v11  ;;  %v250_v37 = vsub.f32 1.0, %v249_v36  ;;  %365 = vmatpush.bf16.msra.mxu2 %v2209_v54  ;;  %v2201_v60 = vor.u32 %v2598_v58, %v2200_v57  ;;  %v2205_v62 = vor.u32 %v2597_v59, %v2202_v61  ;;  %v2192_v63 = vld [vmem:[%s3758_s23 + $0x10] sm:$0xf]  ;;  %v2596_v0 = vld [vmem:[%s3758_s23 + $0x14] sm:$0xf0] }
  0x25   :  { %379 = vmatpush.bf16.msra.mxu3 %v2213_v56  ;;  %v2595_v1 = vld [vmem:[%s3758_s23 + $0x14] sm:$0xf]  ;;  %v2193_v2 = vor.u32 %v2596_v0, %v2192_v63  ;;  %v2194_v3 = vld [vmem:[%s3758_s23 + $0x18] sm:$0xf0]  ;;  %v2184_v5 = vld [vmem:[%s3758_s23] sm:$0xf] }
  0x26   :  { %v251_v38 = vmul.f32 %v2726_v35, %v250_v37  ;;  %v2197_v4 = vor.u32 %v2595_v1, %v2194_v3  ;;  %v2594_v6 = vld [vmem:[%s3758_s23 + $0x4] sm:$0xf0]  ;;  %v2593_v7 = vld [vmem:[%s3758_s23 + $0x4] sm:$0xf]  ;;  %v2186_v10 = vld [vmem:[%s3758_s23 + $0x8] sm:$0xf0] }
  0x27   :  { %215 = vmatpush.bf16.msra.mxu0 %v2578_v12  ;;  %v2185_v9 = vor.u32 %v2594_v6, %v2184_v5  ;;  %v2189_v12 = vor.u32 %v2593_v7, %v2186_v10  ;;  %v2709_v37 = vld [vmem:[%s3760_s29] ss:$0 sm:$0xff]  ;;  %v3162_v7 = vld [vmem:[%s3761_s2 + $0x8] sm:$0xff] }
  0x28   :  { %229 = vmatpush.bf16.msra.mxu1 %v2586_v13  ;;  %v252_v39 = vadd.f32 %v2726_v35, %v251_v38  ;;  %366 = vmatpush.bf16.msra.mxu2 %v2201_v60  ;;  %v3155_v3 = vld [vmem:[%s3761_s2] sm:$0xff] }
  0x29   :  { %380 = vmatpush.bf16.msra.mxu3 %v2205_v62 }
  0x2a   :  { %v3055_v40 = vsel %vm253_vm1, %v2726_v35, %v252_v39 }
  0x2b   :  { %216 = vmatpush.bf16.msra.mxu0 %v2577_v14 }
  0x2c   :  { %230 = vmatpush.bf16.msra.mxu1 %v2585_v15  ;;  %367 = vmatpush.bf16.msra.mxu2 %v2193_v2 }
  0x2d   :  { %381 = vmatpush.bf16.msra.mxu3 %v2197_v4 }
  0x2e   :  { %217 = vmatmul.bf16.vlgmr.msra.gmra.mxu0 %v109_v20 }
  0x2f   :  { %231 = vmatmul.bf16.vlgmr.msra.gmra.mxu1 %v110_v21 }
  0x30   :  { %368 = vmatpush.bf16.msra.mxu2 %v2185_v9 }
  0x31   :  { %382 = vmatpush.bf16.msra.mxu3 %v2189_v12 }
  0xab   :  { %v218_v23 = vpop.f32.mrf.mxu0 }
  0xac   :  { %v232_v24 = vpop.f32.mrf.mxu1  ;;  %v219_v25 = vadd.f32 %v218_v23, %v111_v22 }
  0xae   :  { %v3044_v26 = vadd.f32 %v232_v24, %v219_v25 }
  0xb0   :  { %v242_v27 = vsel %vm241_vm0, %v3044_v26, 0.0 }
  0xb1   :  { %243 = vadd.xlane.f32.xlu0 %v242_v27 }
  0xb3   :  { %v220_v29 = vpop.f32.mrf.mxu0 }
  0xb4   :  { %v221_v30 = vadd.f32 %v220_v29, %v112_v28  ;;  %v234_v31 = vpop.f32.mrf.mxu1 }
  0xb6   :  { %v3051_v32 = vadd.f32 %v234_v31, %v221_v30  ;;  %v2708_v31 = vld [vmem:[%s3759_s25] ss:$0 sm:$0xff] }
  0xb8   :  { %v245_v33 = vsel %vm241_vm0, %v3051_v32, 0.0 }
  0xb9   :  { %246 = vadd.xlane.f32.xlu0 %v245_v33 }
 0x124   :  { %v244_v41 = vpop.xlane.xlu0 %243 }
 0x125   :  { %v255_v42 = vmul.f32 %v3055_v40, %v244_v41 }
 0x127   :  { %v3059_v43 = vsub.f32 %v3044_v26, %v255_v42 }
 0x129   :  { %v259_v44 = vmul.f32 %v3059_v43, %v3059_v43 }
 0x12b   :  { %v261_v45 = vsel %vm241_vm0, %v259_v44, 0.0 }
 0x12c   :  { %262 = vadd.xlane.f32.xlu1 %v261_v45  ;;  %v247_v46 = vpop.xlane.xlu0 %246  ;;  %v312_v45 = vld [vmem:[%s3714_s7] sm:$0x3] }
 0x12d   :  { %v256_v47 = vmul.f32 %v3055_v40, %v247_v46  ;;  %v314_v46 = vperm.slane %v312_v45, 0 }
 0x12f   :  { %v3066_v48 = vsub.f32 %v3051_v32, %v256_v47  ;;  %v315_v47 = vperm.slane %v312_v45, 1 }
 0x131   :  { %v260_v49 = vmul.f32 %v3066_v48, %v3066_v48 }
 0x133   :  { %v264_v50 = vsel %vm241_vm0, %v260_v49, 0.0 }
 0x134   :  { %265 = vadd.xlane.f32.xlu1 %v264_v50 }
 0x19f   :  { %v263_v8 = vpop.xlane.xlu1 %262 }
 0x1a0   :  { %v267_v11 = vmul.f32 %v263_v8, %v3055_v40 }
 0x1a2   :  { %v269_v13 = vadd.f32 1e-06, %v267_v11 }
 0x1a4   :  { %2727 = vrsqrt.f32 %v269_v13  ;;  %vm277_vm3 = vweird.f32 %v269_v13 }
 0x1a7   :  { %v266_v14 = vpop.xlane.xlu1 %265 }
 0x1a8   :  { %v268_v15 = vmul.f32 %v266_v14, %v3055_v40 }
 0x1aa   :  { %v2728_v16 = vpop.eup %2727  ;;  %v270_v17 = vadd.f32 1e-06, %v268_v15 }
 0x1ab   :  { %v272_v18 = vmul.f32 %v2728_v16, %v269_v13  ;;  %vm278_vm2 = vweird.f32 %v2728_v16 }
 0x1ac   :  { %2729 = vrsqrt.f32 %v270_v17  ;;  %vm279_vm4 = vmor %vm277_vm3, %vm278_vm2  ;;  %vm287_vm6 = vweird.f32 %v270_v17 }
 0x1ad   :  { %v273_v19 = vmul.f32 %v2728_v16, %v272_v18 }
 0x1af   :  { %v274_v20 = vmul.f32 0.5, %v273_v19 }
 0x1b1   :  { %v275_v21 = vsub.f32 1.5, %v274_v20 }
 0x1b2   :  { %v2730_v22 = vpop.eup %2729 }
 0x1b3   :  { %v276_v23 = vmul.f32 %v2728_v16, %v275_v21  ;;  %v282_v24 = vmul.f32 %v2730_v22, %v270_v17  ;;  %vm288_vm5 = vweird.f32 %v2730_v22 }
 0x1b4   :  { %vm289_vm7 = vmor %vm287_vm6, %vm288_vm5 }
 0x1b5   :  { %v283_v25 = vmul.f32 %v2730_v22, %v282_v24  ;;  %v280_v27 = vsel %vm279_vm4, %v2728_v16, %v276_v23 }
 0x1b6   :  { %v291_v30 = vmul.f32 %v280_v27, %v3059_v43 }
 0x1b7   :  { %v284_v28 = vmul.f32 0.5, %v283_v25 }
 0x1b8   :  { %v296_v36 = vmul.f32 %v2708_v31, %v291_v30 }
 0x1b9   :  { %v285_v29 = vsub.f32 1.5, %v284_v28 }
 0x1ba   :  { %v301_v39 = vadd.f32 %v2709_v37, %v296_v36 }
 0x1bb   :  { %v286_v33 = vmul.f32 %v2730_v22, %v285_v29 }
 0x1bd   :  { %v290_v34 = vsel %vm289_vm7, %v2730_v22, %v286_v33 }
 0x1be   :  { %v292_v35 = vmul.f32 %v290_v34, %v3066_v48 }
 0x1c0   :  { %v297_v38 = vmul.f32 %v2708_v31, %v292_v35 }
 0x1c2   :  { %v302_v41 = vadd.f32 %v2709_v37, %v297_v38 }
 0x1c4   :  { %v311_v42 = vpack.c.bf16 %v302_v41, %v301_v39 }
 0x1c6   :  { %2214 = vmatmul.msk.bf16.vlgmr.msra.gmra.mxu2 %vm241_vm0, %v311_v42  ;;  %2215 = vmatmul.msk.bf16.vlgmr.msra.gmra.mxu3 %vm241_vm0, %v311_v42 }
 0x249   :  { %v370_v43 = vpop.f32.mrf.mxu2  ;;  %v384_v44 = vpop.f32.mrf.mxu3 }
 0x24a   :  { %v371_v50 = vadd.f32 %v370_v43, %v314_v46  ;;  %v385_v51 = vadd.f32 %v384_v44, %v315_v47 }
 0x251   :  { %v372_v48 = vpop.f32.mrf.mxu2  ;;  %v386_v49 = vpop.f32.mrf.mxu3 }
 0x252   :  { %v373_v52 = vadd.f32 %v372_v48, %v314_v46  ;;  %v387_v53 = vadd.f32 %v386_v49, %v315_v47 }
 0x254   :  { %v389_v54 = vpack.c.bf16 %v373_v52, %v371_v50  ;;  %v3134_v55 = vpack.c.bf16 %v387_v53, %v385_v51 }
 0x256   :  { %448 = vmatpush.bf16.msrb.mxu3 %v3134_v55  ;;  %455 = vrot.lane.b32.xlu1 %v389_v54, %s2858_s28 }
 0x257   :  { %525 = vrot.lane.b32.xlu0 %v389_v54, %s3741_s30  ;;  %391 = vrot.lane.b32.xlu2 %v389_v54, %s3745_s4  ;;  %s3763_s4 = smov 64  }
 0x25f   :  { %457 = vrot.lane.b32.xlu2 %v389_v54, %s3746_s0 }
 0x267   :  { %523 = vrot.lane.b32.xlu2 %v389_v54, %s3739_s1 }
 0x26f   :  { %592 = vrot.lane.b32.xlu2 %v389_v54, %s3743_s5 }
 0x277   :  { %590 = vrot.lane.b32.xlu2 %v389_v54, %s3737_s24 }
 0x2b1   :  { %v392_v56 = vpop.permute.xlu2 %391 }
 0x2b2   :  { %v398_v57 = vsel %vm393_vm8, %v392_v56, 0 }
 0x2b3   :  { %407 = vmatpush.bf16.xpose.msrb.mxu2 %v398_v57 }
 0x2b9   :  { %v458_v58 = vpop.permute.xlu2 %457 }
 0x2ba   :  { %2216 = vmatmul.msk.bf16.vlgmr.msrb.gmra.mxu2 %vm393_vm8, %v389_v54  ;;  %v463_v59 = vsel %vm393_vm8, %v458_v58, 0 }
 0x2bb   :  { %472 = vmatpush.bf16.xpose.msrb.mxu0 %v463_v59 }
 0x2c1   :  { %v524_v60 = vpop.permute.xlu2 %523 }
 0x2c8   :  { %v456_v61 = vpop.permute.xlu1 %455 }
 0x2c9   :  { %v526_v62 = vpop.permute.xlu0 %525  ;;  %v593_v63 = vpop.permute.xlu2 %592  ;;  %2218 = vmatmul.msk.bf16.vlgmr.msrb.gmra.mxu0 %vm393_vm8, %v456_v61 }
 0x2ca   :  { %v531_v0 = vsel %vm393_vm8, %v526_v62, 0  ;;  %v598_v1 = vsel %vm393_vm8, %v593_v63, 0 }
 0x2cb   :  { %540 = vmatpush.bf16.xpose.msra.mxu2 %v531_v0  ;;  %607 = vmatpush.bf16.xpose.msra.mxu0 %v598_v1 }
 0x2d1   :  { %v591_v2 = vpop.permute.xlu2 %590 }
 0x2d2   :  { %2220 = vmatmul.msk.bf16.vlgmr.msra.gmra.mxu2 %vm393_vm8, %v524_v60 }
 0x2d9   :  { %2222 = vmatmul.msk.bf16.vlgmr.msra.gmra.mxu0 %vm393_vm8, %v591_v2 }
 0x33d   :  { %v409_v4 = vpop.f32.mrf.mxu2 }
 0x33e   :  { %v410_v5 = vadd.f32 %v409_v4, %v3155_v3 }
 0x340   :  { %v414_v6 = vsel %vm393_vm8, %v410_v5, -inf }
 0x341   :  { %415 = vmax.xlane.f32.xlu0 %v414_v6 }
 0x345   :  { %v411_v8 = vpop.f32.mrf.mxu2 }
 0x346   :  { %v412_v9 = vadd.f32 %v411_v8, %v3162_v7  ;;  %v474_v10 = vpop.f32.mrf.mxu0 }
 0x347   :  { %v475_v11 = vadd.f32 %v474_v10, %v3155_v3 }
 0x348   :  { %v417_v12 = vsel %vm393_vm8, %v412_v9, -inf }
 0x349   :  { %418 = vmax.xlane.f32.xlu2 %v417_v12  ;;  %v479_v13 = vsel %vm393_vm8, %v475_v11, -inf }
 0x34a   :  { %480 = vmax.xlane.f32.xlu1 %v479_v13 }
 0x34e   :  { %v476_v14 = vpop.f32.mrf.mxu0 }
 0x34f   :  { %v477_v15 = vadd.f32 %v476_v14, %v3162_v7 }
 0x351   :  { %v482_v16 = vsel %vm393_vm8, %v477_v15, -inf }
 0x352   :  { %483 = vmax.xlane.f32.xlu0 %v482_v16 }
 0x355   :  { %v542_v17 = vpop.f32.mrf.mxu2 }
 0x356   :  { %v543_v18 = vadd.f32 %v542_v17, %v3155_v3  ;;  %v609_v19 = vpop.f32.mrf.mxu0 }
 0x357   :  { %v610_v20 = vadd.f32 %v609_v19, %v3155_v3 }
 0x358   :  { %v547_v21 = vsel %vm393_vm8, %v543_v18, -inf }
 0x359   :  { %548 = vmax.xlane.f32.xlu2 %v547_v21  ;;  %v614_v22 = vsel %vm393_vm8, %v610_v20, -inf }
 0x35a   :  { %615 = vmax.xlane.f32.xlu0 %v614_v22 }
 0x35d   :  { %v544_v23 = vpop.f32.mrf.mxu2 }
 0x35e   :  { %v545_v24 = vadd.f32 %v544_v23, %v3162_v7  ;;  %v611_v25 = vpop.f32.mrf.mxu0 }
 0x35f   :  { %v612_v27 = vadd.f32 %v611_v25, %v3162_v7 }
 0x360   :  { %v550_v28 = vsel %vm393_vm8, %v545_v24, -inf }
 0x361   :  { %551 = vmax.xlane.f32.xlu1 %v550_v28  ;;  %v617_v29 = vsel %vm393_vm8, %v612_v27, -inf }
 0x362   :  { %618 = vmax.xlane.f32.xlu2 %v617_v29 }
 0x36e   :  { %503 = vrot.lane.b32.xlu0 %v3134_v55, %s2858_s28 }
 0x3b4   :  { %v416_v30 = vpop.xlane.xlu0 %415 }
 0x3b5   :  { %v420_v31 = vsub.f32 %v410_v5, %v416_v30 }
 0x3b7   :  { %v422_v33 = vmul.f32 1.442695, %v420_v31 }
 0x3b9   :  { %2731 = vpow2.f32 %v422_v33 }
 0x3bc   :  { %v419_v34 = vpop.xlane.xlu2 %418 }
 0x3bd   :  { %v421_v35 = vsub.f32 %v412_v9, %v419_v34  ;;  %v481_v36 = vpop.xlane.xlu1 %480 }
 0x3be   :  { %v485_v37 = vsub.f32 %v475_v11, %v481_v36 }
 0x3bf   :  { %v2732_v38 = vpop.eup %2731  ;;  %v424_v39 = vmul.f32 1.442695, %v421_v35 }
 0x3c0   :  { %v487_v41 = vmul.f32 1.442695, %v485_v37  ;;  %v426_v42 = vsel %vm393_vm8, %v2732_v38, 0.0 }
 0x3c1   :  { %2733 = vpow2.f32 %v424_v39  ;;  %427 = vadd.xlane.f32.xlu1 %v426_v42 }
 0x3c2   :  { %2735 = vpow2.f32 %v487_v41 }
 0x3c5   :  { %v484_v43 = vpop.xlane.xlu0 %483 }
 0x3c6   :  { %v486_v44 = vsub.f32 %v477_v15, %v484_v43 }
 0x3c7   :  { %v2734_v45 = vpop.eup %2733 }
 0x3c8   :  { %v2736_v46 = vpop.eup %2735  ;;  %v489_v47 = vmul.f32 1.442695, %v486_v44  ;;  %v429_v48 = vsel %vm393_vm8, %v2734_v45, 0.0 }
 0x3c9   :  { %430 = vadd.xlane.f32.xlu0 %v429_v48  ;;  %v491_v49 = vsel %vm393_vm8, %v2736_v46, 0.0 }
 0x3ca   :  { %2737 = vpow2.f32 %v489_v47  ;;  %492 = vadd.xlane.f32.xlu2 %v491_v49 }
 0x3cc   :  { %v549_v50 = vpop.xlane.xlu2 %548 }
 0x3cd   :  { %v616_v51 = vpop.xlane.xlu0 %615  ;;  %v553_v54 = vsub.f32 %v543_v18, %v549_v50 }
 0x3ce   :  { %v620_v52 = vsub.f32 %v610_v20, %v616_v51 }
 0x3cf   :  { %v555_v58 = vmul.f32 1.442695, %v553_v54 }
 0x3d0   :  { %v2738_v53 = vpop.eup %2737  ;;  %v622_v56 = vmul.f32 1.442695, %v620_v52 }
 0x3d1   :  { %v494_v57 = vsel %vm393_vm8, %v2738_v53, 0.0 }
 0x3d2   :  { %2739 = vpow2.f32 %v622_v56  ;;  %495 = vadd.xlane.f32.xlu1 %v494_v57  ;;  %v2604_v56 = vld [vmem:[%s3715_s8 + $0x18] sm:$0xff]  ;;  %v2603_v57 = vld [vmem:[%s3715_s8 + $0x10] sm:$0xff] }
 0x3d3   :  { %2741 = vpow2.f32 %v555_v58  ;;  %729 = vmatpush.bf16.msrb.mxu2 %v2604_v56  ;;  %v2602_v58 = vld [vmem:[%s3715_s8 + $0x8] sm:$0xff]  ;;  %v2605_v56 = vld [vmem:[%s3719_s12 + $0x4] sm:$0xf] }
 0x3d4   :  { %v552_v59 = vpop.xlane.xlu1 %551 }
 0x3d5   :  { %v554_v60 = vsub.f32 %v545_v24, %v552_v59  ;;  %v619_v61 = vpop.xlane.xlu2 %618  ;;  %v2601_v59 = vld [vmem:[%s3715_s8] sm:$0xff] }
 0x3d6   :  { %v621_v63 = vsub.f32 %v612_v27, %v619_v61 }
 0x3d7   :  { %v557_v62 = vmul.f32 1.442695, %v554_v60  ;;  %730 = vmatpush.bf16.msrb.mxu2 %v2603_v57 }
 0x3d8   :  { %v2740_v0 = vpop.eup %2739  ;;  %v624_v2 = vmul.f32 1.442695, %v621_v63 }
 0x3d9   :  { %2743 = vpow2.f32 %v557_v62  ;;  %v626_v1 = vsel %vm393_vm8, %v2740_v0, 0.0  ;;  %v2742_v4 = vpop.eup %2741 }
 0x3da   :  { %627 = vadd.xlane.f32.xlu2 %v626_v1  ;;  %2745 = vpow2.f32 %v624_v2  ;;  %v559_v9 = vsel %vm393_vm8, %v2742_v4, 0.0 }
 0x3db   :  { %731 = vmatpush.bf16.msrb.mxu2 %v2602_v58 }
 0x3dd   :  { %637 = vrot.lane.b32.xlu0 %v3134_v55, %s3737_s24  ;;  %s3767_s24 = smov 80  }
 0x3df   :  { %v2744_v5 = vpop.eup %2743  ;;  %732 = vmatpush.bf16.msrb.mxu2 %v2601_v59  ;;  %v2245_v59 = vld [vmem:[%s3719_s12 + $0x8] sm:$0xf0] }
 0x3e0   :  { %v562_v6 = vsel %vm393_vm8, %v2744_v5, 0.0  ;;  %v504_v8 = vpop.permute.xlu0 %503  ;;  %v2746_v10 = vpop.eup %2745 }
 0x3e1   :  { %563 = vadd.xlane.f32.xlu1 %v562_v6  ;;  %516 = vmatpush.bf16.msrb.mxu1 %v504_v8  ;;  %v629_v11 = vsel %vm393_vm8, %v2746_v10, 0.0 }
 0x3e2   :  { %560 = vadd.xlane.f32.xlu2 %v559_v9 }
 0x3e9   :  { %630 = vadd.xlane.f32.xlu1 %v629_v11 }
 0x3fa   :  { %570 = vrot.lane.b32.xlu2 %v3134_v55, %s3739_s1 }
 0x434   :  { %v428_v12 = vpop.xlane.xlu1 %427 }
 0x435   :  { %2747 = vrcp.f32 %v428_v12 }
 0x43b   :  { %v2748_v14 = vpop.eup %2747 }
 0x43c   :  { %v431_v13 = vpop.xlane.xlu0 %430  ;;  %v434_v17 = vmul.f32 %v2748_v14, %v2732_v38  ;;  %v2710_v14 = vld [vmem:[%s3716_s9] ss:$0 sm:$0xff] }
 0x43d   :  { %2749 = vrcp.f32 %v431_v13  ;;  %v493_v15 = vpop.xlane.xlu2 %492 }
 0x43e   :  { %2751 = vrcp.f32 %v493_v15 }
 0x443   :  { %v2750_v16 = vpop.eup %2749 }
 0x444   :  { %v435_v18 = vmul.f32 %v2750_v16, %v2734_v45  ;;  %v2752_v21 = vpop.eup %2751 }
 0x445   :  { %v496_v19 = vpop.xlane.xlu1 %495  ;;  %v499_v23 = vmul.f32 %v2752_v21, %v2736_v46 }
 0x446   :  { %2753 = vrcp.f32 %v496_v19  ;;  %v436_v20 = vpack.c.bf16 %v435_v18, %v434_v17 }
 0x448   :  { %2217 = vmatmul.msk.bf16.vlgmr.msrb.gmra.mxu3 %vm393_vm8, %v436_v20 }
 0x44c   :  { %v2754_v22 = vpop.eup %2753 }
 0x44d   :  { %v500_v24 = vmul.f32 %v2754_v22, %v2738_v53  ;;  %v628_v55 = vpop.xlane.xlu2 %627 }
 0x44f   :  { %v638_v25 = vpop.permute.xlu0 %637  ;;  %v501_v27 = vpack.c.bf16 %v500_v24, %v499_v23 }
 0x450   :  { %650 = vmatpush.bf16.msra.mxu1 %v638_v25 }
 0x451   :  { %2219 = vmatmul.msk.bf16.vlgmr.msrb.gmra.mxu1 %vm393_vm8, %v501_v27 }
 0x454   :  { %v564_v28 = vpop.xlane.xlu1 %563 }
 0x455   :  { %2755 = vrcp.f32 %v564_v28  ;;  %v561_v29 = vpop.xlane.xlu2 %560 }
 0x456   :  { %2757 = vrcp.f32 %v561_v29 }
 0x457   :  { %2759 = vrcp.f32 %v628_v55 }
 0x45b   :  { %v2756_v30 = vpop.eup %2755 }
 0x45c   :  { %v2758_v31 = vpop.eup %2757  ;;  %v631_v33 = vpop.xlane.xlu1 %630  ;;  %v568_v34 = vmul.f32 %v2756_v30, %v2744_v5 }
 0x45d   :  { %v567_v35 = vmul.f32 %v2758_v31, %v2742_v4  ;;  %2761 = vrcp.f32 %v631_v33  ;;  %v571_v36 = vpop.permute.xlu2 %570  ;;  %v2760_v38 = vpop.eup %2759  ;;  %v2267_v31 = vld [vmem:[%s3719_s12 + $0x30] sm:$0xf]  ;;  %v2612_v33 = vld [vmem:[%s3719_s12 + $0x34] sm:$0xf0] }
 0x45e   :  { %583 = vmatpush.bf16.msra.mxu3 %v571_v36  ;;  %v634_v41 = vmul.f32 %v2760_v38, %v2740_v0  ;;  %v2269_v36 = vld [vmem:[%s3719_s12 + $0x38] sm:$0xf0]  ;;  %v2259_v38 = vld [vmem:[%s3719_s12 + $0x20] sm:$0xf] }
 0x45f   :  { %v569_v37 = vpack.c.bf16 %v568_v34, %v567_v35  ;;  %v2611_v34 = vld [vmem:[%s3719_s12 + $0x34] sm:$0xf]  ;;  %v2268_v35 = vor.u32 %v2612_v33, %v2267_v31  ;;  %v2618_v31 = vld [vmem:[%s3721_s14 + $0x28] sm:$0xff]  ;;  %v2624_v33 = vld [vmem:[%s3721_s14 + $0x58] sm:$0xff] }
 0x461   :  { %2221 = vmatmul.msk.bf16.vlgmr.msra.gmra.mxu3 %vm393_vm8, %v569_v37  ;;  %v2272_v37 = vor.u32 %v2611_v34, %v2269_v36  ;;  %v2617_v34 = vld [vmem:[%s3721_s14 + $0x20] sm:$0xff]  ;;  %v2616_v36 = vld [vmem:[%s3721_s14 + $0x18] sm:$0xff] }
 0x462   :  { %865 = vmatpush.bf16.msrb.mxu3 %v2268_v35  ;;  %v2623_v35 = vld [vmem:[%s3721_s14 + $0x50] sm:$0xff] }
 0x463   :  { %v2762_v39 = vpop.eup %2761  ;;  %879 = vmatpush.bf16.msrb.mxu0 %v2272_v37  ;;  %v2622_v37 = vld [vmem:[%s3721_s14 + $0x48] sm:$0xff] }
 0x464   :  { %v635_v42 = vmul.f32 %v2762_v39, %v2746_v10  ;;  %v2610_v39 = vld [vmem:[%s3719_s12 + $0x24] sm:$0xf0] }
 0x466   :  { %v636_v43 = vpack.c.bf16 %v635_v42, %v634_v41  ;;  %v2609_v41 = vld [vmem:[%s3719_s12 + $0x24] sm:$0xf]  ;;  %v2260_v42 = vor.u32 %v2610_v39, %v2259_v38  ;;  %v812_v38 = vld [vmem:[%s3720_s13] sm:$0x3]  ;;  %v2615_v39 = vld [vmem:[%s3721_s14 + $0x10] sm:$0xff] }
 0x468   :  { %2223 = vmatmul.msk.bf16.vlgmr.msra.gmra.mxu1 %vm393_vm8, %v636_v43  ;;  %v2261_v43 = vld [vmem:[%s3719_s12 + $0x28] sm:$0xf0]  ;;  %866 = vmatpush.bf16.msrb.mxu3 %v2260_v42  ;;  %v815_v42 = vperm.slane %v812_v38, 1 }
 0x4cb   :  { %v450_v45 = vpop.f32.mrf.mxu3 }
 0x4ce   :  { %v518_v44 = vpop.f32.mrf.mxu1 }
 0x4d3   :  { %v452_v48 = vpop.f32.mrf.mxu3 }
 0x4d6   :  { %v520_v46 = vpop.f32.mrf.mxu1 }
 0x4d7   :  { %v2678_v47 = vpack.i.bf16 %v520_v46, %v518_v44  ;;  %v2264_v44 = vor.u32 %v2609_v41, %v2261_v43  ;;  %v2608_v46 = vld [vmem:[%s3719_s12 + $0x14] sm:$0xf0]  ;;  %v2621_v41 = vld [vmem:[%s3721_s14 + $0x40] sm:$0xff]  ;;  %v2614_v43 = vld [vmem:[%s3721_s14 + $0x8] sm:$0xff] }
 0x4d9   :  { %2679 = vrot.lane.b32.xlu1 %v2678_v47, %s3743_s5  ;;  %880 = vmatpush.bf16.msrb.mxu0 %v2264_v44  ;;  %v2607_v47 = vld [vmem:[%s3719_s12 + $0x14] sm:$0xf]  ;;  %s3766_s5 = smov 32  }
 0x4e4   :  { %v585_v49 = vpop.f32.mrf.mxu3 }
 0x4e5   :  { %v652_v50 = vpop.f32.mrf.mxu1 }
 0x4ec   :  { %v587_v51 = vpop.f32.mrf.mxu3 }
 0x4ed   :  { %v2683_v52 = vpack.i.bf16 %v587_v51, %v585_v49  ;;  %v654_v53 = vpop.f32.mrf.mxu1  ;;  %v2253_v49 = vld [vmem:[%s3719_s12 + $0x18] sm:$0xf0] }
 0x4ee   :  { %v2688_v54 = vpack.i.bf16 %v654_v53, %v652_v50  ;;  %v2256_v51 = vor.u32 %v2607_v47, %v2253_v49  ;;  %v2243_v53 = vld [vmem:[%s3719_s12] sm:$0xf] }
 0x4ef   :  { %2684 = vrot.lane.b32.xlu0 %v2683_v52, %s3741_s30 }
 0x4f0   :  { %881 = vmatpush.bf16.msrb.mxu0 %v2256_v51 }
 0x4f7   :  { %2689 = vrot.lane.b32.xlu0 %v2688_v54, %s3746_s0  ;;  %v2606_v54 = vld [vmem:[%s3719_s12 + $0x4] sm:$0xf0]  ;;  %s3765_s0 = smov 96  }
 0x4f8   :  { %v2244_v58 = vor.u32 %v2606_v54, %v2243_v53 }
 0x54b   :  { %v2680_v61 = vpop.permute.xlu1 %2679 }
 0x54c   :  { %v2682_v62 = vunpack.i.h.bf16 %v2680_v61  ;;  %v2681_v63 = vunpack.i.l.bf16 %v2680_v61 }
 0x54e   :  { %v682_v4 = vsel %vm393_vm8, %v452_v48, %v2682_v62  ;;  %v681_v5 = vsel %vm393_vm8, %v450_v45, %v2681_v63  ;;  %v2251_v45 = vld [vmem:[%s3719_s12 + $0x10] sm:$0xf] }
 0x54f   :  { %v2252_v48 = vor.u32 %v2608_v46, %v2251_v45  ;;  %v2613_v46 = vld [vmem:[%s3721_s14] sm:$0xff] }
 0x551   :  { %867 = vmatpush.bf16.msrb.mxu3 %v2252_v48  ;;  %v814_v48 = vperm.slane %v812_v38, 0 }
 0x555   :  { %868 = vmatpush.bf16.msrb.mxu3 %v2244_v58 }
 0x561   :  { %v2685_v60 = vpop.permute.xlu0 %2684 }
 0x562   :  { %v2687_v0 = vunpack.i.h.bf16 %v2685_v60  ;;  %v2686_v1 = vunpack.i.l.bf16 %v2685_v60  ;;  %v2248_v60 = vor.u32 %v2605_v56, %v2245_v59 }
 0x564   :  { %v685_v9 = vsel %vm683_vm9, %v682_v4, %v2687_v0  ;;  %v684_v10 = vsel %vm683_vm9, %v681_v5, %v2686_v1  ;;  %882 = vmatpush.bf16.msrb.mxu0 %v2248_v60 }
 0x569   :  { %v2690_v2 = vpop.permute.xlu0 %2689 }
 0x56a   :  { %v2692_v6 = vunpack.i.h.bf16 %v2690_v2  ;;  %v2691_v8 = vunpack.i.l.bf16 %v2690_v2 }
 0x56c   :  { %v687_v11 = vsel %vm686_vm10, %v684_v10, %v2691_v8  ;;  %v688_v12 = vsel %vm686_vm10, %v685_v9, %v2692_v6 }
 0x56d   :  { %v697_v13 = vpack.c.bf16 %v688_v12, %v687_v11 }
 0x56f   :  { %2240 = vmatmul.msk.bf16.vlgmr.msrb.gmra.mxu2 %vm241_vm0, %v697_v13 }
 0x5f2   :  { %v734_v15 = vpop.f32.mrf.mxu2 }
 0x5f3   :  { %v739_v16 = vadd.f32 %v734_v15, %v3044_v26 }
 0x5f5   :  { %v3222_v17 = vadd.f32 %v2710_v14, %v739_v16 }
 0x5f7   :  { %v749_v18 = vsel %vm241_vm0, %v3222_v17, 0.0 }
 0x5f8   :  { %750 = vadd.xlane.f32.xlu2 %v749_v18 }
 0x5fa   :  { %v736_v19 = vpop.f32.mrf.mxu2 }
 0x5fb   :  { %v740_v20 = vadd.f32 %v736_v19, %v3051_v32  ;;  %v2712_v19 = vld [vmem:[%s3718_s11] ss:$0 sm:$0xff] }
 0x5fd   :  { %v3227_v21 = vadd.f32 %v2710_v14, %v740_v20  ;;  %v2711_v14 = vld [vmem:[%s3717_s10] ss:$0 sm:$0xff] }
 0x5ff   :  { %v752_v22 = vsel %vm241_vm0, %v3227_v21, 0.0 }
 0x600   :  { %753 = vadd.xlane.f32.xlu0 %v752_v22 }
 0x66b   :  { %v751_v23 = vpop.xlane.xlu2 %750 }
 0x66c   :  { %v755_v24 = vmul.f32 %v751_v23, %v3055_v40 }
 0x66e   :  { %v3233_v26 = vsub.f32 %v3222_v17, %v755_v24 }
 0x670   :  { %v759_v55 = vmul.f32 %v3233_v26, %v3233_v26 }
 0x672   :  { %v761_v25 = vsel %vm241_vm0, %v759_v55, 0.0 }
 0x673   :  { %762 = vadd.xlane.f32.xlu1 %v761_v25  ;;  %v754_v27 = vpop.xlane.xlu0 %753 }
 0x674   :  { %v756_v32 = vmul.f32 %v754_v27, %v3055_v40  ;;  %v2627_v27 = vld [vmem:[%s3721_s14 + $0x70] sm:$0xff] }
 0x676   :  { %v3240_v28 = vsub.f32 %v3227_v21, %v756_v32  ;;  %v2620_v32 = vld [vmem:[%s3721_s14 + $0x38] sm:$0xff] }
 0x677   :  { %1055 = vmatpush.bf16.msrb.mxu1 %v2620_v32 }
 0x678   :  { %v760_v29 = vmul.f32 %v3240_v28, %v3240_v28 }
 0x67a   :  { %v764_v30 = vsel %vm241_vm0, %v760_v29, 0.0  ;;  %v2619_v29 = vld [vmem:[%s3721_s14 + $0x30] sm:$0xff] }
 0x67b   :  { %765 = vadd.xlane.f32.xlu2 %v764_v30  ;;  %1056 = vmatpush.bf16.msrb.mxu1 %v2619_v29  ;;  %v2625_v30 = vld [vmem:[%s3721_s14 + $0x60] sm:$0xff] }
 0x67f   :  { %1057 = vmatpush.bf16.msrb.mxu1 %v2618_v31 }
 0x683   :  { %1058 = vmatpush.bf16.msrb.mxu1 %v2617_v34 }
 0x687   :  { %1059 = vmatpush.bf16.msrb.mxu1 %v2616_v36 }
 0x68b   :  { %1060 = vmatpush.bf16.msrb.mxu1 %v2615_v39 }
 0x68f   :  { %1061 = vmatpush.bf16.msrb.mxu1 %v2614_v43 }
 0x693   :  { %1062 = vmatpush.bf16.msrb.mxu1 %v2613_v46 }
 0x6e6   :  { %v763_v50 = vpop.xlane.xlu1 %762 }
 0x6e7   :  { %v767_v52 = vmul.f32 %v763_v50, %v3055_v40 }
 0x6e9   :  { %v769_v57 = vadd.f32 1e-06, %v767_v52 }
 0x6eb   :  { %2763 = vrsqrt.f32 %v769_v57  ;;  %vm777_vm12 = vweird.f32 %v769_v57 }
 0x6ee   :  { %v766_v61 = vpop.xlane.xlu2 %765 }
 0x6ef   :  { %v768_v62 = vmul.f32 %v766_v61, %v3055_v40 }
 0x6f1   :  { %v2764_v63 = vpop.eup %2763  ;;  %v770_v0 = vadd.f32 1e-06, %v768_v62 }
 0x6f2   :  { %v772_v1 = vmul.f32 %v2764_v63, %v769_v57  ;;  %vm778_vm11 = vweird.f32 %v2764_v63 }
 0x6f3   :  { %2765 = vrsqrt.f32 %v770_v0  ;;  %vm779_vm13 = vmor %vm777_vm12, %vm778_vm11  ;;  %vm787_vm15 = vweird.f32 %v770_v0 }
 0x6f4   :  { %v773_v2 = vmul.f32 %v2764_v63, %v772_v1 }
 0x6f6   :  { %v774_v4 = vmul.f32 0.5, %v773_v2 }
 0x6f8   :  { %v775_v5 = vsub.f32 1.5, %v774_v4 }
 0x6f9   :  { %v2766_v6 = vpop.eup %2765 }
 0x6fa   :  { %v776_v8 = vmul.f32 %v2764_v63, %v775_v5  ;;  %v782_v9 = vmul.f32 %v2766_v6, %v770_v0  ;;  %vm788_vm14 = vweird.f32 %v2766_v6 }
 0x6fb   :  { %vm789_vm1 = vmor %vm787_vm15, %vm788_vm14 }
 0x6fc   :  { %v783_v10 = vmul.f32 %v2766_v6, %v782_v9  ;;  %v780_v11 = vsel %vm779_vm13, %v2764_v63, %v776_v8 }
 0x6fd   :  { %v791_v15 = vmul.f32 %v780_v11, %v3233_v26  ;;  %v2628_v26 = vld [vmem:[%s3721_s14 + $0x78] sm:$0xff] }
 0x6fe   :  { %v784_v12 = vmul.f32 0.5, %v783_v10  ;;  %1069 = vmatpush.bf16.msra.mxu2 %v2628_v26 }
 0x6ff   :  { %v796_v20 = vmul.f32 %v2711_v14, %v791_v15 }
 0x700   :  { %v785_v13 = vsub.f32 1.5, %v784_v12 }
 0x701   :  { %v801_v24 = vadd.f32 %v2712_v19, %v796_v20 }
 0x702   :  { %v786_v16 = vmul.f32 %v2766_v6, %v785_v13  ;;  %1070 = vmatpush.bf16.msra.mxu2 %v2627_v27 }
 0x704   :  { %v790_v18 = vsel %vm789_vm1, %v2766_v6, %v786_v16 }
 0x705   :  { %v792_v22 = vmul.f32 %v790_v18, %v3240_v28  ;;  %v2626_v28 = vld [vmem:[%s3721_s14 + $0x68] sm:$0xff] }
 0x706   :  { %1071 = vmatpush.bf16.msra.mxu2 %v2626_v28 }
 0x707   :  { %v797_v23 = vmul.f32 %v2711_v14, %v792_v22 }
 0x709   :  { %v802_v55 = vadd.f32 %v2712_v19, %v797_v23 }
 0x70a   :  { %1072 = vmatpush.bf16.msra.mxu2 %v2625_v30 }
 0x70b   :  { %v811_v25 = vpack.c.bf16 %v802_v55, %v801_v24 }
 0x70d   :  { %2273 = vmatmul.msk.bf16.vlgmr.msrb.gmra.mxu3 %vm241_vm0, %v811_v25  ;;  %2274 = vmatmul.msk.bf16.vlgmr.msrb.gmra.mxu0 %vm241_vm0, %v811_v25 }
 0x70e   :  { %1073 = vmatpush.bf16.msra.mxu2 %v2624_v33 }
 0x712   :  { %1074 = vmatpush.bf16.msra.mxu2 %v2623_v35  ;;  %v2713_v35 = vld [vmem:[%s3722_s15] ss:$0 sm:$0xff] }
 0x716   :  { %1075 = vmatpush.bf16.msra.mxu2 %v2622_v37 }
 0x71a   :  { %1076 = vmatpush.bf16.msra.mxu2 %v2621_v41 }
 0x78a   :  { %v884_v44 = vpop.f32.mrf.mxu0 }
 0x78b   :  { %v885_v45 = vadd.f32 %v884_v44, %v815_v42 }
 0x78d   :  { %v894_v47 = vmul.f32 0.044715, %v885_v45  ;;  %v890_v16 = vmul.f32 0.5, %v885_v45 }
 0x78f   :  { %v898_v49 = vmul.f32 %v894_v47, %v885_v45 }
 0x790   :  { %v870_v50 = vpop.f32.mrf.mxu3 }
 0x791   :  { %v902_v51 = vmul.f32 %v898_v49, %v885_v45  ;;  %v871_v52 = vadd.f32 %v870_v50, %v814_v48 }
 0x792   :  { %v886_v53 = vpop.f32.mrf.mxu0 }
 0x793   :  { %v906_v54 = vadd.f32 %v902_v51, %v885_v45  ;;  %v893_v56 = vmul.f32 0.044715, %v871_v52  ;;  %v887_v57 = vadd.f32 %v886_v53, %v815_v42  ;;  %v889_v26 = vmul.f32 0.5, %v871_v52 }
 0x795   :  { %v897_v58 = vmul.f32 %v893_v56, %v871_v52  ;;  %v896_v59 = vmul.f32 0.044715, %v887_v57  ;;  %v910_v60 = vmul.f32 0.7978846, %v906_v54  ;;  %v892_v18 = vmul.f32 0.5, %v887_v57 }
 0x796   :  { %v2376_v54 = vld [vmem:[%s3758_s23 + $0x70] sm:$0xf]  ;;  %v2636_v56 = vld [vmem:[%s3758_s23 + $0x74] sm:$0xf0] }
 0x797   :  { %v901_v61 = vmul.f32 %v897_v58, %v871_v52  ;;  %v900_v62 = vmul.f32 %v896_v59, %v887_v57  ;;  %2767 = vtanh.f32 %v910_v60  ;;  %v2377_v58 = vor.u32 %v2636_v56, %v2376_v54  ;;  %v2378_v59 = vld [vmem:[%s3758_s23 + $0x78] sm:$0xf0] }
 0x798   :  { %v872_v63 = vpop.f32.mrf.mxu3 }
 0x799   :  { %v905_v0 = vadd.f32 %v901_v61, %v871_v52  ;;  %v904_v1 = vmul.f32 %v900_v62, %v887_v57  ;;  %v873_v2 = vadd.f32 %v872_v63, %v814_v48  ;;  %1213 = vmatpush.bf16.msra.mxu3 %v2377_v58  ;;  %v2368_v61 = vld [vmem:[%s3758_s23 + $0x60] sm:$0xf]  ;;  %v2634_v62 = vld [vmem:[%s3758_s23 + $0x64] sm:$0xf0]  ;;  %v2633_v63 = vld [vmem:[%s3758_s23 + $0x64] sm:$0xf] }
 0x79b   :  { %v908_v4 = vadd.f32 %v904_v1, %v887_v57  ;;  %v895_v5 = vmul.f32 0.044715, %v873_v2  ;;  %v909_v6 = vmul.f32 0.7978846, %v905_v0  ;;  %v891_v27 = vmul.f32 0.5, %v873_v2 }
 0x79c   :  { %v2635_v57 = vld [vmem:[%s3758_s23 + $0x74] sm:$0xf]  ;;  %v2369_v0 = vor.u32 %v2634_v62, %v2368_v61  ;;  %v2370_v1 = vld [vmem:[%s3758_s23 + $0x68] sm:$0xf0] }
 0x79d   :  { %v912_v8 = vmul.f32 0.7978846, %v908_v4  ;;  %v899_v9 = vmul.f32 %v895_v5, %v873_v2  ;;  %v2768_v11 = vpop.eup %2767  ;;  %v2381_v60 = vor.u32 %v2635_v57, %v2378_v59  ;;  %v2360_v4 = vld [vmem:[%s3758_s23 + $0x50] sm:$0xf]  ;;  %v2632_v5 = vld [vmem:[%s3758_s23 + $0x54] sm:$0xf0] }
 0x79e   :  { %v918_v14 = vadd.f32 1.0, %v2768_v11  ;;  %1214 = vmatpush.bf16.msra.mxu3 %v2369_v0 }
 0x79f   :  { %v903_v10 = vmul.f32 %v899_v9, %v873_v2  ;;  %2769 = vtanh.f32 %v912_v8  ;;  %1227 = vmatpush.bf16.msra.mxu0 %v2381_v60  ;;  %v2361_v8 = vor.u32 %v2632_v5, %v2360_v4  ;;  %v2362_v9 = vld [vmem:[%s3758_s23 + $0x58] sm:$0xf0] }
 0x7a0   :  { %2771 = vtanh.f32 %v909_v6  ;;  %v922_v22 = vmul.f32 %v918_v14, %v890_v16  ;;  %v2631_v6 = vld [vmem:[%s3758_s23 + $0x54] sm:$0xf]  ;;  %v2630_v14 = vld [vmem:[%s3758_s23 + $0x44] sm:$0xf0] }
 0x7a1   :  { %v907_v12 = vadd.f32 %v903_v10, %v873_v2  ;;  %v2373_v2 = vor.u32 %v2633_v63, %v2370_v1  ;;  %v2365_v11 = vor.u32 %v2631_v6, %v2362_v9 }
 0x7a2   :  { %1215 = vmatpush.bf16.msra.mxu3 %v2361_v8 }
 0x7a3   :  { %v911_v13 = vmul.f32 0.7978846, %v907_v12  ;;  %1228 = vmatpush.bf16.msra.mxu0 %v2373_v2 }
 0x7a5   :  { %v2770_v15 = vpop.eup %2769  ;;  %2773 = vtanh.f32 %v911_v13  ;;  %v2352_v13 = vld [vmem:[%s3758_s23 + $0x40] sm:$0xf] }
 0x7a6   :  { %v920_v19 = vadd.f32 1.0, %v2770_v15  ;;  %v2772_v20 = vpop.eup %2771  ;;  %v2629_v15 = vld [vmem:[%s3758_s23 + $0x44] sm:$0xf] }
 0x7a7   :  { %v917_v55 = vadd.f32 1.0, %v2772_v20  ;;  %1229 = vmatpush.bf16.msra.mxu0 %v2365_v11 }
 0x7a8   :  { %v924_v23 = vmul.f32 %v920_v19, %v892_v18  ;;  %v2353_v18 = vor.u32 %v2630_v14, %v2352_v13  ;;  %v2354_v19 = vld [vmem:[%s3758_s23 + $0x48] sm:$0xf0]  ;;  %s2109_s23 = sshll.u32 %s3729_s22, 4  ;;  %s2110_s23 = int_to_ptr.hbm [resolvable:$true] %s2109_s23 }
 0x7a9   :  { %v921_v28 = vmul.f32 %v917_v55, %v889_v26  ;;  %v2357_v20 = vor.u32 %v2629_v15, %v2354_v19 }
 0x7aa   :  { %v958_v24 = vpack.c.bf16 %v924_v23, %v922_v22  ;;  %1216 = vmatpush.bf16.msra.mxu3 %v2353_v18 }
 0x7ab   :  { %v2774_v25 = vpop.eup %2773  ;;  %1230 = vmatpush.bf16.msra.mxu0 %v2357_v20 }
 0x7ac   :  { %1077 = vmatmul.bf16.vlgmr.msra.gmra.mxu2 %v958_v24  ;;  %v919_v32 = vadd.f32 1.0, %v2774_v25 }
 0x7ae   :  { %v923_v29 = vmul.f32 %v919_v32, %v891_v27 }
 0x7b0   :  { %v957_v30 = vpack.c.bf16 %v923_v29, %v921_v28 }
 0x7b2   :  { %1063 = vmatmul.bf16.vlgmr.msrb.gmra.mxu1 %v957_v30 }
 0x82f   :  { %v1064_v31 = vpop.f32.mrf.mxu1  ;;  %v1078_v33 = vpop.f32.mrf.mxu2 }
 0x830   :  { %v1079_v34 = vadd.f32 %v1078_v33, %v1064_v31 }
 0x832   :  { %v1083_v36 = vadd.f32 %v1079_v34, %v3222_v17 }
 0x834   :  { %v3360_v37 = vadd.f32 %v2713_v35, %v1083_v36  ;;  %v2714_v36 = vld [vmem:[%s3759_s25 + $0x1] ss:$0 sm:$0xff] }
 0x836   :  { %v1095_v38 = vsel %vm241_vm0, %v3360_v37, 0.0 }
 0x837   :  { %v1080_v39 = vpop.f32.mrf.mxu2  ;;  %1096 = vadd.xlane.f32.xlu0 %v1095_v38  ;;  %v1066_v41 = vpop.f32.mrf.mxu1 }
 0x838   :  { %v1081_v42 = vadd.f32 %v1080_v39, %v1066_v41 }
 0x83a   :  { %v1084_v43 = vadd.f32 %v1081_v42, %v3227_v21  ;;  %v2715_v42 = vld [vmem:[%s3760_s29 + $0x1] ss:$0 sm:$0xff]  ;;  %s3762_s29 = smov 48  }
 0x83c   :  { %v3365_v44 = vadd.f32 %v2713_v35, %v1084_v43 }
 0x83e   :  { %v1098_v45 = vsel %vm241_vm0, %v3365_v44, 0.0 }
 0x83f   :  { %1099 = vadd.xlane.f32.xlu1 %v1098_v45 }
 0x8aa   :  { %v1097_v46 = vpop.xlane.xlu0 %1096 }
 0x8ab   :  { %v1101_v17 = vmul.f32 %v1097_v46, %v3055_v40 }
 0x8ad   :  { %v3371_v47 = vsub.f32 %v3360_v37, %v1101_v17 }
 0x8af   :  { %v1105_v48 = vmul.f32 %v3371_v47, %v3371_v47 }
 0x8b1   :  { %v1107_v49 = vsel %vm241_vm0, %v1105_v48, 0.0 }
 0x8b2   :  { %1108 = vadd.xlane.f32.xlu2 %v1107_v49  ;;  %v1100_v50 = vpop.xlane.xlu1 %1099 }
 0x8b3   :  { %v1102_v21 = vmul.f32 %v1100_v50, %v3055_v40  ;;  %v2349_v50 = vld [vmem:[%s3714_s7 + $0x2] sm:$0x3]  ;;  %s3764_s7 = smov 16  }
 0x8b4   :  { %v1162_v57 = vperm.slane %v2349_v50, 0 }
 0x8b5   :  { %v3378_v51 = vsub.f32 %v3365_v44, %v1102_v21  ;;  %v1163_v21 = vperm.slane %v2349_v50, 1 }
 0x8b7   :  { %v1106_v52 = vmul.f32 %v3378_v51, %v3378_v51 }
 0x8b9   :  { %v1110_v53 = vsel %vm241_vm0, %v1106_v52, 0.0 }
 0x8ba   :  { %1111 = vadd.xlane.f32.xlu0 %v1110_v53 }
 0x925   :  { %v1109_v10 = vpop.xlane.xlu2 %1108 }
 0x926   :  { %v1113_v12 = vmul.f32 %v1109_v10, %v3055_v40 }
 0x928   :  { %v1115_v16 = vadd.f32 1e-06, %v1113_v12 }
 0x92a   :  { %2775 = vrsqrt.f32 %v1115_v16  ;;  %vm1123_vm3 = vweird.f32 %v1115_v16 }
 0x92d   :  { %v1112_v22 = vpop.xlane.xlu0 %1111 }
 0x92e   :  { %v1114_v23 = vmul.f32 %v1112_v22, %v3055_v40 }
 0x930   :  { %v2776_v24 = vpop.eup %2775  ;;  %v1116_v55 = vadd.f32 1e-06, %v1114_v23 }
 0x931   :  { %v1118_v25 = vmul.f32 %v2776_v24, %v1115_v16  ;;  %vm1124_vm2 = vweird.f32 %v2776_v24 }
 0x932   :  { %2777 = vrsqrt.f32 %v1116_v55  ;;  %vm1125_vm4 = vmor %vm1123_vm3, %vm1124_vm2  ;;  %vm1133_vm6 = vweird.f32 %v1116_v55 }
 0x933   :  { %v1119_v26 = vmul.f32 %v2776_v24, %v1118_v25 }
 0x935   :  { %v1120_v27 = vmul.f32 0.5, %v1119_v26 }
 0x937   :  { %v1121_v32 = vsub.f32 1.5, %v1120_v27  ;;  %v2829_v27 = vld [vmem:[%s3761_s2 + $0x8] sm:$0xff] }
 0x938   :  { %v2778_v28 = vpop.eup %2777 }
 0x939   :  { %v1122_v29 = vmul.f32 %v2776_v24, %v1121_v32  ;;  %v1128_v30 = vmul.f32 %v2778_v28, %v1116_v55  ;;  %vm1134_vm5 = vweird.f32 %v2778_v28 }
 0x93a   :  { %vm1135_vm7 = vmor %vm1133_vm6, %vm1134_vm5  ;;  %vm2013_vm5 = vcmask 1040384   ;;  %vm2017_vm6 = vcmask 517120  }
 0x93b   :  { %v1129_v31 = vmul.f32 %v2778_v28, %v1128_v30  ;;  %v1126_v33 = vsel %vm1125_vm4, %v2776_v24, %v1122_v29  ;;  %v2830_v30 = vld [vmem:[%s3761_s2] sm:$0xff] }
 0x93c   :  { %v1137_v38 = vmul.f32 %v1126_v33, %v3371_v47 }
 0x93d   :  { %v1130_v34 = vmul.f32 0.5, %v1129_v31 }
 0x93e   :  { %v1142_v43 = vmul.f32 %v2714_v36, %v1137_v38 }
 0x93f   :  { %v1131_v35 = vsub.f32 1.5, %v1130_v34 }
 0x940   :  { %v1147_v17 = vadd.f32 %v2715_v42, %v1142_v43 }
 0x941   :  { %v1132_v39 = vmul.f32 %v2778_v28, %v1131_v35 }
 0x943   :  { %v1136_v41 = vsel %vm1135_vm7, %v2778_v28, %v1132_v39 }
 0x944   :  { %v1138_v45 = vmul.f32 %v1136_v41, %v3378_v51 }
 0x946   :  { %v1143_v46 = vmul.f32 %v2714_v36, %v1138_v45 }
 0x948   :  { %v1148_v48 = vadd.f32 %v2715_v42, %v1143_v46 }
 0x94a   :  { %v1158_v49 = vpack.c.bf16 %v1148_v48, %v1147_v17 }
 0x94c   :  { %2382 = vmatmul.msk.bf16.vlgmr.msra.gmra.mxu3 %vm241_vm0, %v1158_v49  ;;  %2383 = vmatmul.msk.bf16.vlgmr.msra.gmra.mxu0 %vm241_vm0, %v1158_v49 }
 0x9c9   :  { %v1232_v47 = vpop.f32.mrf.mxu0 }
 0x9ca   :  { %v1233_v54 = vadd.f32 %v1232_v47, %v1163_v21 }
 0x9cf   :  { %v1218_v52 = vpop.f32.mrf.mxu3 }
 0x9d0   :  { %v1219_v59 = vadd.f32 %v1218_v52, %v1162_v57 }
 0x9d1   :  { %v1234_v53 = vpop.f32.mrf.mxu0 }
 0x9d2   :  { %v1235_v56 = vadd.f32 %v1234_v53, %v1163_v21 }
 0x9d4   :  { %v3446_v51 = vpack.c.bf16 %v1235_v56, %v1233_v54 }
 0x9d6   :  { %1295 = vmatpush.bf16.msrb.mxu0 %v3446_v51 }
 0x9d7   :  { %v1220_v58 = vpop.f32.mrf.mxu3 }
 0x9d8   :  { %v1221_v60 = vadd.f32 %v1220_v58, %v1162_v57 }
 0x9da   :  { %v1237_v61 = vpack.c.bf16 %v1221_v60, %v1219_v59 }
 0x9dc   :  { %1302 = vrot.lane.b32.xlu0 %v1237_v61, %s2858_s28  ;;  %1304 = vrot.lane.b32.xlu2 %v1237_v61, %s3762_s29 }
 0x9dd   :  { %1239 = vrot.lane.b32.xlu1 %v1237_v61, %s3763_s4 }
 0x9e4   :  { %1439 = vrot.lane.b32.xlu0 %v1237_v61, %s3764_s7  ;;  %1370 = vrot.lane.b32.xlu2 %v1237_v61, %s3765_s0 }
 0x9e5   :  { %1372 = vrot.lane.b32.xlu1 %v1237_v61, %s3766_s5 }
 0x9ed   :  { %1437 = vrot.lane.b32.xlu1 %v1237_v61, %s3767_s24 }
 0xa36   :  { %v1305_v62 = vpop.permute.xlu2 %1304 }
 0xa37   :  { %v1310_v63 = vsel %vm393_vm8, %v1305_v62, 0 }
 0xa38   :  { %1319 = vmatpush.bf16.xpose.msra.mxu1 %v1310_v63 }
 0xa3e   :  { %v1371_v10 = vpop.permute.xlu2 %1370 }
 0xa4e   :  { %v1303_v0 = vpop.permute.xlu0 %1302 }
 0xa4f   :  { %v1240_v1 = vpop.permute.xlu1 %1239  ;;  %2386 = vmatmul.msk.bf16.vlgmr.msra.gmra.mxu1 %vm393_vm8, %v1303_v0 }
 0xa50   :  { %v1245_v2 = vsel %vm393_vm8, %v1240_v1, 0 }
 0xa51   :  { %1254 = vmatpush.bf16.xpose.msrb.mxu3 %v1245_v2 }
 0xa56   :  { %v1440_v4 = vpop.permute.xlu0 %1439 }
 0xa57   :  { %v1445_v5 = vsel %vm393_vm8, %v1440_v4, 0  ;;  %v1373_v6 = vpop.permute.xlu1 %1372 }
 0xa58   :  { %v1378_v8 = vsel %vm393_vm8, %v1373_v6, 0  ;;  %2384 = vmatmul.msk.bf16.vlgmr.msrb.gmra.mxu3 %vm393_vm8, %v1237_v61  ;;  %1454 = vmatpush.bf16.xpose.msrb.mxu1 %v1445_v5 }
 0xa59   :  { %1387 = vmatpush.bf16.xpose.msra.mxu3 %v1378_v8 }
 0xa5f   :  { %v1438_v9 = vpop.permute.xlu1 %1437 }
 0xa60   :  { %2390 = vmatmul.msk.bf16.vlgmr.msrb.gmra.mxu1 %vm393_vm8, %v1438_v9 }
 0xa68   :  { %2388 = vmatmul.msk.bf16.vlgmr.msra.gmra.mxu3 %vm393_vm8, %v1371_v10 }
 0xacc   :  { %v1321_v11 = vpop.f32.mrf.mxu1 }
 0xacd   :  { %v1322_v12 = vadd.f32 %v1321_v11, %v3155_v3 }
 0xacf   :  { %v1326_v13 = vsel %vm393_vm8, %v1322_v12, -inf }
 0xad0   :  { %1327 = vmax.xlane.f32.xlu0 %v1326_v13 }
 0xad4   :  { %v1323_v14 = vpop.f32.mrf.mxu1 }
 0xad5   :  { %v1324_v15 = vadd.f32 %v1323_v14, %v3162_v7 }
 0xad7   :  { %v1329_v16 = vsel %vm393_vm8, %v1324_v15, -inf }
 0xad8   :  { %1330 = vmax.xlane.f32.xlu2 %v1329_v16 }
 0xadb   :  { %v1256_v18 = vpop.f32.mrf.mxu3 }
 0xadc   :  { %v1257_v19 = vadd.f32 %v1256_v18, %v3155_v3 }
 0xadd   :  { %v1456_v20 = vpop.f32.mrf.mxu1 }
 0xade   :  { %v1457_v22 = vadd.f32 %v1456_v20, %v3155_v3  ;;  %v1261_v23 = vsel %vm393_vm8, %v1257_v19, -inf }
 0xadf   :  { %1262 = vmax.xlane.f32.xlu1 %v1261_v23 }
 0xae0   :  { %v1461_v24 = vsel %vm393_vm8, %v1457_v22, -inf }
 0xae1   :  { %1462 = vmax.xlane.f32.xlu2 %v1461_v24 }
 0xae3   :  { %v1258_v55 = vpop.f32.mrf.mxu3 }
 0xae4   :  { %v1259_v25 = vadd.f32 %v1258_v55, %v3162_v7 }
 0xae5   :  { %v1458_v26 = vpop.f32.mrf.mxu1 }
 0xae6   :  { %v1459_v32 = vadd.f32 %v2829_v27, %v1458_v26  ;;  %v1264_v28 = vsel %vm393_vm8, %v1259_v25, -inf }
 0xae7   :  { %1265 = vmax.xlane.f32.xlu0 %v1264_v28 }
 0xae8   :  { %v1464_v3 = vsel %vm393_vm8, %v1459_v32, -inf }
 0xae9   :  { %1465 = vmax.xlane.f32.xlu1 %v1464_v3 }
 0xaeb   :  { %v1389_v29 = vpop.f32.mrf.mxu3 }
 0xaec   :  { %v1390_v31 = vadd.f32 %v2830_v30, %v1389_v29 }
 0xaee   :  { %v1394_v7 = vsel %vm393_vm8, %v1390_v31, -inf }
 0xaef   :  { %1395 = vmax.xlane.f32.xlu0 %v1394_v7 }
 0xaf3   :  { %v1391_v33 = vpop.f32.mrf.mxu3 }
 0xaf4   :  { %v1392_v34 = vadd.f32 %v2829_v27, %v1391_v33 }
 0xaf6   :  { %v1397_v35 = vsel %vm393_vm8, %v1392_v34, -inf }
 0xaf7   :  { %1398 = vmax.xlane.f32.xlu2 %v1397_v35 }
 0xb03   :  { %1350 = vrot.lane.b32.xlu0 %v3446_v51, %s2858_s28 }
 0xb43   :  { %v1328_v36 = vpop.xlane.xlu0 %1327 }
 0xb44   :  { %v1332_v38 = vsub.f32 %v1322_v12, %v1328_v36 }
 0xb46   :  { %v1334_v39 = vmul.f32 1.442695, %v1332_v38 }
 0xb48   :  { %2779 = vpow2.f32 %v1334_v39 }
 0xb4b   :  { %v1331_v41 = vpop.xlane.xlu2 %1330 }
 0xb4c   :  { %v1333_v42 = vsub.f32 %v1324_v15, %v1331_v41 }
 0xb4e   :  { %v2780_v43 = vpop.eup %2779  ;;  %v1336_v45 = vmul.f32 1.442695, %v1333_v42 }
 0xb4f   :  { %v1338_v46 = vsel %vm393_vm8, %v2780_v43, 0.0 }
 0xb50   :  { %2781 = vpow2.f32 %v1336_v45  ;;  %1339 = vadd.xlane.f32.xlu1 %v1338_v46 }
 0xb52   :  { %v1263_v17 = vpop.xlane.xlu1 %1262 }
 0xb53   :  { %v1267_v48 = vsub.f32 %v1257_v19, %v1263_v17 }
 0xb54   :  { %v1463_v49 = vpop.xlane.xlu2 %1462 }
 0xb55   :  { %v1269_v47 = vmul.f32 1.442695, %v1267_v48  ;;  %v1467_v50 = vsub.f32 %v1457_v22, %v1463_v49 }
 0xb56   :  { %v2782_v21 = vpop.eup %2781 }
 0xb57   :  { %2783 = vpow2.f32 %v1269_v47  ;;  %v1341_v52 = vsel %vm393_vm8, %v2782_v21, 0.0  ;;  %v1469_v53 = vmul.f32 1.442695, %v1467_v50 }
 0xb58   :  { %1342 = vadd.xlane.f32.xlu0 %v1341_v52 }
 0xb59   :  { %2785 = vpow2.f32 %v1469_v53 }
 0xb5a   :  { %v1266_v54 = vpop.xlane.xlu0 %1265 }
 0xb5b   :  { %v1268_v56 = vsub.f32 %v1259_v25, %v1266_v54 }
 0xb5c   :  { %v1466_v57 = vpop.xlane.xlu1 %1465 }
 0xb5d   :  { %v2784_v58 = vpop.eup %2783  ;;  %v1271_v59 = vmul.f32 1.442695, %v1268_v56  ;;  %v1468_v60 = vsub.f32 %v1459_v32, %v1466_v57 }
 0xb5e   :  { %v1273_v61 = vsel %vm393_vm8, %v2784_v58, 0.0 }
 0xb5f   :  { %2787 = vpow2.f32 %v1271_v59  ;;  %1274 = vadd.xlane.f32.xlu2 %v1273_v61  ;;  %v1471_v62 = vmul.f32 1.442695, %v1468_v60  ;;  %v2786_v0 = vpop.eup %2785  ;;  %v2640_v60 = vld [vmem:[%s3715_s8 + $0x38] sm:$0xff]  ;;  %v2639_v61 = vld [vmem:[%s3715_s8 + $0x30] sm:$0xff] }
 0xb60   :  { %v1473_v6 = vsel %vm393_vm8, %v2786_v0, 0.0  ;;  %1575 = vmatpush.bf16.msrb.mxu3 %v2640_v60  ;;  %v2433_v60 = vld [vmem:[%s3719_s12 + $0x48] sm:$0xf0] }
 0xb61   :  { %2789 = vpow2.f32 %v1471_v62  ;;  %v2638_v62 = vld [vmem:[%s3715_s8 + $0x28] sm:$0xff] }
 0xb62   :  { %v1396_v63 = vpop.xlane.xlu0 %1395 }
 0xb63   :  { %v1400_v1 = vsub.f32 %v1390_v31, %v1396_v63  ;;  %v2637_v63 = vld [vmem:[%s3715_s8 + $0x20] sm:$0xff] }
 0xb64   :  { %1576 = vmatpush.bf16.msrb.mxu3 %v2639_v61 }
 0xb65   :  { %v2788_v2 = vpop.eup %2787  ;;  %v1402_v4 = vmul.f32 1.442695, %v1400_v1 }
 0xb66   :  { %v1276_v5 = vsel %vm393_vm8, %v2788_v2, 0.0 }
 0xb67   :  { %2791 = vpow2.f32 %v1402_v4  ;;  %1277 = vadd.xlane.f32.xlu1 %v1276_v5  ;;  %1474 = vadd.xlane.f32.xlu2 %v1473_v6  ;;  %v2790_v9 = vpop.eup %2789 }
 0xb68   :  { %v1476_v14 = vsel %vm393_vm8, %v2790_v9, 0.0  ;;  %1577 = vmatpush.bf16.msrb.mxu3 %v2638_v62 }
 0xb6a   :  { %v1399_v8 = vpop.xlane.xlu2 %1398 }
 0xb6b   :  { %v1401_v10 = vsub.f32 %v1392_v34, %v1399_v8 }
 0xb6c   :  { %1417 = vrot.lane.b32.xlu0 %v3446_v51, %s3765_s0  ;;  %1578 = vmatpush.bf16.msrb.mxu3 %v2637_v63 }
 0xb6d   :  { %v2792_v11 = vpop.eup %2791  ;;  %v1404_v12 = vmul.f32 1.442695, %v1401_v10 }
 0xb6e   :  { %v1406_v13 = vsel %vm393_vm8, %v2792_v11, 0.0 }
 0xb6f   :  { %2793 = vpow2.f32 %v1404_v12  ;;  %1407 = vadd.xlane.f32.xlu2 %v1406_v13  ;;  %1477 = vadd.xlane.f32.xlu1 %v1476_v14 }
 0xb75   :  { %v2794_v15 = vpop.eup %2793  ;;  %v1351_v16 = vpop.permute.xlu0 %1350 }
 0xb76   :  { %1363 = vmatpush.bf16.msrb.mxu2 %v1351_v16  ;;  %v1409_v18 = vsel %vm393_vm8, %v2794_v15, 0.0 }
 0xb77   :  { %1410 = vadd.xlane.f32.xlu1 %v1409_v18 }
 0xb87   :  { %1484 = vrot.lane.b32.xlu2 %v3446_v51, %s3767_s24  ;;  %s2865_s24 = smov [#allocation2]  }
 0xb88   :  { %s2107_s6 = sshll.u32 %s2865_s24, 4  ;;  %s2108_s6 = int_to_ptr.vmem [resolvable:$true] %s2107_s6 }
 0xbc3   :  { %v1340_v19 = vpop.xlane.xlu1 %1339 }
 0xbc4   :  { %2795 = vrcp.f32 %v1340_v19  ;;  %v2716_v19 = vld [vmem:[%s3716_s9 + $0x1] ss:$0 sm:$0xff] }
 0xbca   :  { %v2796_v22 = vpop.eup %2795 }
 0xbcb   :  { %v1343_v20 = vpop.xlane.xlu0 %1342  ;;  %v1346_v55 = vmul.f32 %v2796_v22, %v2780_v43 }
 0xbcc   :  { %2797 = vrcp.f32 %v1343_v20 }
 0xbd2   :  { %v2798_v23 = vpop.eup %2797  ;;  %v1275_v24 = vpop.xlane.xlu2 %1274 }
 0xbd3   :  { %v1347_v25 = vmul.f32 %v2798_v23, %v2782_v21  ;;  %2799 = vrcp.f32 %v1275_v24 }
 0xbd5   :  { %v1348_v26 = vpack.c.bf16 %v1347_v25, %v1346_v55 }
 0xbd7   :  { %2387 = vmatmul.msk.bf16.vlgmr.msrb.gmra.mxu2 %vm393_vm8, %v1348_v26 }
 0xbd9   :  { %v2800_v3 = vpop.eup %2799 }
 0xbda   :  { %v1475_v27 = vpop.xlane.xlu2 %1474  ;;  %v1278_v32 = vpop.xlane.xlu1 %1277  ;;  %v1281_v31 = vmul.f32 %v2800_v3, %v2784_v58 }
 0xbdb   :  { %2801 = vrcp.f32 %v1278_v32 }
 0xbdc   :  { %2803 = vrcp.f32 %v1475_v27 }
 0xbde   :  { %v1418_v28 = vpop.permute.xlu0 %1417 }
 0xbdf   :  { %1430 = vmatpush.bf16.msra.mxu0 %v1418_v28 }
 0xbe1   :  { %v2802_v51 = vpop.eup %2801 }
 0xbe2   :  { %v1408_v29 = vpop.xlane.xlu2 %1407  ;;  %v1478_v30 = vpop.xlane.xlu1 %1477  ;;  %v1282_v7 = vmul.f32 %v2802_v51, %v2788_v2 }
 0xbe3   :  { %2805 = vrcp.f32 %v1478_v30  ;;  %v2804_v34 = vpop.eup %2803 }
 0xbe4   :  { %v1283_v33 = vpack.c.bf16 %v1282_v7, %v1281_v31  ;;  %2807 = vrcp.f32 %v1408_v29  ;;  %v1481_v39 = vmul.f32 %v2804_v34, %v2786_v0  ;;  %v2648_v34 = vld [vmem:[%s3719_s12 + $0x74] sm:$0xf0] }
 0xbe6   :  { %2385 = vmatmul.msk.bf16.vlgmr.msrb.gmra.mxu0 %vm393_vm8, %v1283_v33  ;;  %v2455_v33 = vld [vmem:[%s3719_s12 + $0x70] sm:$0xf] }
 0xbe9   :  { %v2806_v35 = vpop.eup %2805 }
 0xbea   :  { %v1485_v36 = vpop.permute.xlu2 %1484  ;;  %v1411_v38 = vpop.xlane.xlu1 %1410  ;;  %v1482_v41 = vmul.f32 %v2806_v35, %v2790_v9  ;;  %v2647_v35 = vld [vmem:[%s3719_s12 + $0x74] sm:$0xf] }
 0xbeb   :  { %2809 = vrcp.f32 %v1411_v38  ;;  %1497 = vmatpush.bf16.msra.mxu2 %v1485_v36  ;;  %v2808_v43 = vpop.eup %2807  ;;  %v2456_v36 = vor.u32 %v2648_v34, %v2455_v33  ;;  %v2457_v38 = vld [vmem:[%s3719_s12 + $0x78] sm:$0xf0] }
 0xbec   :  { %v1483_v42 = vpack.c.bf16 %v1482_v41, %v1481_v39  ;;  %v1414_v46 = vmul.f32 %v2808_v43, %v2792_v11  ;;  %v2460_v39 = vor.u32 %v2647_v35, %v2457_v38  ;;  %v2447_v41 = vld [vmem:[%s3719_s12 + $0x60] sm:$0xf]  ;;  %v2645_v43 = vld [vmem:[%s3719_s12 + $0x64] sm:$0xf]  ;;  %v2652_v33 = vld [vmem:[%s3721_s14 + $0x98] sm:$0xff] }
 0xbed   :  { %1716 = vmatpush.bf16.msrb.mxu0 %v2456_v36  ;;  %v2660_v34 = vld [vmem:[%s3721_s14 + $0xd8] sm:$0xff]  ;;  %v2651_v35 = vld [vmem:[%s3721_s14 + $0x90] sm:$0xff]  ;;  %v2650_v38 = vld [vmem:[%s3721_s14 + $0x88] sm:$0xff] }
 0xbee   :  { %2391 = vmatmul.msk.bf16.vlgmr.msra.gmra.mxu2 %vm393_vm8, %v1483_v42  ;;  %1730 = vmatpush.bf16.msra.mxu1 %v2460_v39  ;;  %v2646_v42 = vld [vmem:[%s3719_s12 + $0x64] sm:$0xf0]  ;;  %v2659_v36 = vld [vmem:[%s3721_s14 + $0xd0] sm:$0xff] }
 0xbef   :  { %v2658_v39 = vld [vmem:[%s3721_s14 + $0xc8] sm:$0xff] }
 0xbf1   :  { %v2810_v45 = vpop.eup %2809 }
 0xbf2   :  { %v1415_v17 = vmul.f32 %v2810_v45, %v2794_v15  ;;  %v2448_v45 = vor.u32 %v2646_v42, %v2447_v41  ;;  %v2428_v41 = vld [vmem:[%s3720_s13 + $0x2] sm:$0x3] }
 0xbf3   :  { %v2649_v42 = vld [vmem:[%s3721_s14 + $0x80] sm:$0xff] }
 0xbf4   :  { %v1416_v48 = vpack.c.bf16 %v1415_v17, %v1414_v46  ;;  %v2449_v46 = vld [vmem:[%s3719_s12 + $0x68] sm:$0xf0]  ;;  %1717 = vmatpush.bf16.msrb.mxu0 %v2448_v45  ;;  %v1665_v45 = vperm.slane %v2428_v41, 0 }
 0xbf5   :  { %v2452_v17 = vor.u32 %v2645_v43, %v2449_v46  ;;  %v2657_v43 = vld [vmem:[%s3721_s14 + $0xc0] sm:$0xff]  ;;  %v1666_v46 = vperm.slane %v2428_v41, 1 }
 0xbf6   :  { %2389 = vmatmul.msk.bf16.vlgmr.msra.gmra.mxu0 %vm393_vm8, %v1416_v48  ;;  %v2439_v48 = vld [vmem:[%s3719_s12 + $0x50] sm:$0xf] }
 0xbf7   :  { %1731 = vmatpush.bf16.msra.mxu1 %v2452_v17 }
 0xc5a   :  { %v1365_v49 = vpop.f32.mrf.mxu2 }
 0xc62   :  { %v1367_v47 = vpop.f32.mrf.mxu2 }
 0xc63   :  { %v2693_v50 = vpack.i.bf16 %v1367_v47, %v1365_v49  ;;  %v1297_v21 = vpop.f32.mrf.mxu0  ;;  %v2644_v49 = vld [vmem:[%s3719_s12 + $0x54] sm:$0xf0]  ;;  %v2643_v47 = vld [vmem:[%s3719_s12 + $0x54] sm:$0xf] }
 0xc65   :  { %2694 = vrot.lane.b32.xlu1 %v2693_v50, %s3764_s7  ;;  %v2440_v50 = vor.u32 %v2644_v49, %v2439_v48 }
 0xc67   :  { %1718 = vmatpush.bf16.msrb.mxu0 %v2440_v50 }
 0xc6b   :  { %v1299_v52 = vpop.f32.mrf.mxu0 }
 0xc71   :  { %v1499_v54 = vpop.f32.mrf.mxu2 }
 0xc73   :  { %v1432_v53 = vpop.f32.mrf.mxu0 }
 0xc79   :  { %v1501_v58 = vpop.f32.mrf.mxu2 }
 0xc7a   :  { %v2703_v59 = vpack.i.bf16 %v1501_v58, %v1499_v54  ;;  %v2641_v58 = vld [vmem:[%s3719_s12 + $0x44] sm:$0xf] }
 0xc7b   :  { %v1434_v56 = vpop.f32.mrf.mxu0  ;;  %v2436_v62 = vor.u32 %v2641_v58, %v2433_v60 }
 0xc7c   :  { %v2698_v57 = vpack.i.bf16 %v1434_v56, %v1432_v53  ;;  %v2431_v56 = vld [vmem:[%s3719_s12 + $0x40] sm:$0xf] }
 0xc7e   :  { %2699 = vrot.lane.b32.xlu0 %v2698_v57, %s3766_s5  ;;  %v2642_v57 = vld [vmem:[%s3719_s12 + $0x44] sm:$0xf0] }
 0xc86   :  { %2704 = vrot.lane.b32.xlu0 %v2703_v59, %s3762_s29  ;;  %v2432_v59 = vor.u32 %v2642_v57, %v2431_v56 }
 0xc88   :  { %1719 = vmatpush.bf16.msrb.mxu0 %v2432_v59 }
 0xcd7   :  { %v2695_v1 = vpop.permute.xlu1 %2694 }
 0xcd8   :  { %v2697_v2 = vunpack.i.h.bf16 %v2695_v1  ;;  %v2696_v4 = vunpack.i.l.bf16 %v2695_v1 }
 0xcda   :  { %v1529_v9 = vsel %vm393_vm8, %v1299_v52, %v2697_v2  ;;  %v1528_v10 = vsel %vm393_vm8, %v1297_v21, %v2696_v4  ;;  %v2441_v21 = vld [vmem:[%s3719_s12 + $0x58] sm:$0xf0] }
 0xcdb   :  { %v2444_v52 = vor.u32 %v2643_v47, %v2441_v21 }
 0xcdd   :  { %1732 = vmatpush.bf16.msra.mxu1 %v2444_v52 }
 0xce1   :  { %1733 = vmatpush.bf16.msra.mxu1 %v2436_v62 }
 0xcf0   :  { %v2700_v0 = vpop.permute.xlu0 %2699 }
 0xcf1   :  { %v2702_v5 = vunpack.i.h.bf16 %v2700_v0  ;;  %v2701_v6 = vunpack.i.l.bf16 %v2700_v0 }
 0xcf3   :  { %v1530_v13 = vsel %vm683_vm9, %v1528_v10, %v2701_v6  ;;  %v1531_v14 = vsel %vm683_vm9, %v1529_v9, %v2702_v5 }
 0xcf8   :  { %v2705_v8 = vpop.permute.xlu0 %2704 }
 0xcf9   :  { %v2707_v11 = vunpack.i.h.bf16 %v2705_v8  ;;  %v2706_v12 = vunpack.i.l.bf16 %v2705_v8 }
 0xcfb   :  { %v1532_v15 = vsel %vm686_vm10, %v1530_v13, %v2706_v12  ;;  %v1533_v16 = vsel %vm686_vm10, %v1531_v14, %v2707_v11 }
 0xcfc   :  { %v1543_v18 = vpack.c.bf16 %v1533_v16, %v1532_v15  ;;  %v2717_v16 = vld [vmem:[%s3717_s10 + $0x1] ss:$0 sm:$0xff] }
 0xcfe   :  { %2416 = vmatmul.msk.bf16.vlgmr.msrb.gmra.mxu3 %vm241_vm0, %v1543_v18 }
 0xd81   :  { %v1580_v20 = vpop.f32.mrf.mxu3 }
 0xd82   :  { %v1585_v22 = vadd.f32 %v1580_v20, %v3360_v37 }
 0xd84   :  { %v3527_v23 = vadd.f32 %v2716_v19, %v1585_v22  ;;  %v2718_v22 = vld [vmem:[%s3718_s11 + $0x1] ss:$0 sm:$0xff] }
 0xd86   :  { %v1598_v24 = vsel %vm241_vm0, %v3527_v23, 0.0 }
 0xd87   :  { %1599 = vadd.xlane.f32.xlu2 %v1598_v24 }
 0xd89   :  { %v1582_v55 = vpop.f32.mrf.mxu3 }
 0xd8a   :  { %v1586_v25 = vadd.f32 %v1582_v55, %v3365_v44 }
 0xd8c   :  { %v3532_v26 = vadd.f32 %v2716_v19, %v1586_v25 }
 0xd8e   :  { %v1601_v27 = vsel %vm241_vm0, %v3532_v26, 0.0 }
 0xd8f   :  { %1602 = vadd.xlane.f32.xlu0 %v1601_v27 }
 0xdfa   :  { %v1600_v32 = vpop.xlane.xlu2 %1599 }
 0xdfb   :  { %v1604_v28 = vmul.f32 %v1600_v32, %v3055_v40 }
 0xdfd   :  { %v3538_v37 = vsub.f32 %v3527_v23, %v1604_v28 }
 0xdff   :  { %v1608_v3 = vmul.f32 %v3538_v37, %v3538_v37 }
 0xe01   :  { %v1610_v51 = vsel %vm241_vm0, %v1608_v3, 0.0  ;;  %v2664_v3 = vld [vmem:[%s3721_s14 + $0xf8] sm:$0xff] }
 0xe02   :  { %1611 = vadd.xlane.f32.xlu1 %v1610_v51  ;;  %v1603_v29 = vpop.xlane.xlu0 %1602  ;;  %1921 = vmatpush.bf16.msra.mxu3 %v2664_v3  ;;  %v2655_v51 = vld [vmem:[%s3721_s14 + $0xb0] sm:$0xff] }
 0xe03   :  { %v1605_v44 = vmul.f32 %v1603_v29, %v3055_v40  ;;  %v2663_v29 = vld [vmem:[%s3721_s14 + $0xf0] sm:$0xff] }
 0xe05   :  { %v3545_v30 = vsub.f32 %v3532_v26, %v1605_v44  ;;  %v2654_v44 = vld [vmem:[%s3721_s14 + $0xa8] sm:$0xff] }
 0xe06   :  { %1922 = vmatpush.bf16.msra.mxu3 %v2663_v29 }
 0xe07   :  { %v1609_v31 = vmul.f32 %v3545_v30, %v3545_v30 }
 0xe09   :  { %v1613_v7 = vsel %vm241_vm0, %v1609_v31, 0.0  ;;  %v2653_v31 = vld [vmem:[%s3721_s14 + $0xa0] sm:$0xff] }
 0xe0a   :  { %1614 = vadd.xlane.f32.xlu2 %v1613_v7  ;;  %v2661_v7 = vld [vmem:[%s3721_s14 + $0xe0] sm:$0xff] }
 0xe75   :  { %v1612_v53 = vpop.xlane.xlu1 %1611 }
 0xe76   :  { %v1616_v54 = vmul.f32 %v1612_v53, %v3055_v40 }
 0xe78   :  { %v1618_v61 = vadd.f32 1e-06, %v1616_v54 }
 0xe7a   :  { %2811 = vrsqrt.f32 %v1618_v61  ;;  %vm1626_vm9 = vweird.f32 %v1618_v61 }
 0xe7d   :  { %v1615_v63 = vpop.xlane.xlu2 %1614 }
 0xe7e   :  { %v1617_v0 = vmul.f32 %v1615_v63, %v3055_v40 }
 0xe80   :  { %v2812_v1 = vpop.eup %2811  ;;  %v1619_v2 = vadd.f32 1e-06, %v1617_v0 }
 0xe81   :  { %v1621_v4 = vmul.f32 %v2812_v1, %v1618_v61  ;;  %vm1627_vm8 = vweird.f32 %v2812_v1 }
 0xe82   :  { %2813 = vrsqrt.f32 %v1619_v2  ;;  %vm1628_vm10 = vmor %vm1626_vm9, %vm1627_vm8  ;;  %vm1636_vm12 = vweird.f32 %v1619_v2 }
 0xe83   :  { %v1622_v5 = vmul.f32 %v2812_v1, %v1621_v4 }
 0xe85   :  { %v1623_v6 = vmul.f32 0.5, %v1622_v5 }
 0xe87   :  { %v1624_v8 = vsub.f32 1.5, %v1623_v6 }
 0xe88   :  { %v2814_v9 = vpop.eup %2813 }
 0xe89   :  { %v1625_v10 = vmul.f32 %v2812_v1, %v1624_v8  ;;  %v1631_v11 = vmul.f32 %v2814_v9, %v1619_v2  ;;  %vm1637_vm11 = vweird.f32 %v2814_v9 }
 0xe8a   :  { %vm1638_vm13 = vmor %vm1636_vm12, %vm1637_vm11 }
 0xe8b   :  { %v1632_v12 = vmul.f32 %v2814_v9, %v1631_v11  ;;  %v1629_v13 = vsel %vm1628_vm10, %v2812_v1, %v1625_v10 }
 0xe8c   :  { %v1640_v18 = vmul.f32 %v1629_v13, %v3538_v37  ;;  %v2656_v37 = vld [vmem:[%s3721_s14 + $0xb8] sm:$0xff] }
 0xe8d   :  { %v1633_v14 = vmul.f32 0.5, %v1632_v12  ;;  %1907 = vmatpush.bf16.msrb.mxu2 %v2656_v37 }
 0xe8e   :  { %v1645_v24 = vmul.f32 %v2717_v16, %v1640_v18 }
 0xe8f   :  { %v1634_v15 = vsub.f32 1.5, %v1633_v14 }
 0xe90   :  { %v1650_v27 = vadd.f32 %v2718_v22, %v1645_v24 }
 0xe91   :  { %v1635_v19 = vmul.f32 %v2814_v9, %v1634_v15  ;;  %1908 = vmatpush.bf16.msrb.mxu2 %v2655_v51 }
 0xe93   :  { %v1639_v20 = vsel %vm1638_vm13, %v2814_v9, %v1635_v19 }
 0xe94   :  { %v1641_v55 = vmul.f32 %v1639_v20, %v3545_v30  ;;  %v2662_v30 = vld [vmem:[%s3721_s14 + $0xe8] sm:$0xff] }
 0xe95   :  { %1909 = vmatpush.bf16.msrb.mxu2 %v2654_v44  ;;  %1923 = vmatpush.bf16.msra.mxu3 %v2662_v30 }
 0xe96   :  { %v1646_v25 = vmul.f32 %v2717_v16, %v1641_v55 }
 0xe98   :  { %v1651_v32 = vadd.f32 %v2718_v22, %v1646_v25 }
 0xe99   :  { %1910 = vmatpush.bf16.msrb.mxu2 %v2653_v31  ;;  %1924 = vmatpush.bf16.msra.mxu3 %v2661_v7  ;;  %v2719_v7 = vld [vmem:[%s3722_s15 + $0x1] ss:$0 sm:$0xff] }
 0xe9a   :  { %v1661_v28 = vpack.c.bf16 %v1651_v32, %v1650_v27 }
 0xe9c   :  { %2461 = vmatmul.msk.bf16.vlgmr.msrb.gmra.mxu0 %vm241_vm0, %v1661_v28  ;;  %2462 = vmatmul.msk.bf16.vlgmr.msra.gmra.mxu1 %vm241_vm0, %v1661_v28 }
 0xe9d   :  { %1911 = vmatpush.bf16.msrb.mxu2 %v2652_v33  ;;  %1925 = vmatpush.bf16.msra.mxu3 %v2660_v34 }
 0xea1   :  { %1912 = vmatpush.bf16.msrb.mxu2 %v2651_v35  ;;  %1926 = vmatpush.bf16.msra.mxu3 %v2659_v36 }
 0xea5   :  { %1913 = vmatpush.bf16.msrb.mxu2 %v2650_v38  ;;  %1927 = vmatpush.bf16.msra.mxu3 %v2658_v39 }
 0xea9   :  { %1914 = vmatpush.bf16.msrb.mxu2 %v2649_v42  ;;  %1928 = vmatpush.bf16.msra.mxu3 %v2657_v43 }
 0xf19   :  { %v1721_v17 = vpop.f32.mrf.mxu0  ;;  %v1735_v48 = vpop.f32.mrf.mxu1 }
 0xf1a   :  { %v1722_v49 = vadd.f32 %v1721_v17, %v1665_v45  ;;  %v1736_v47 = vadd.f32 %v1735_v48, %v1666_v46 }
 0xf1c   :  { %v1744_v50 = vmul.f32 0.044715, %v1722_v49  ;;  %v1745_v21 = vmul.f32 0.044715, %v1736_v47  ;;  %v1740_v20 = vmul.f32 0.5, %v1722_v49  ;;  %v1741_v55 = vmul.f32 0.5, %v1736_v47 }
 0xf1e   :  { %v1748_v52 = vmul.f32 %v1744_v50, %v1722_v49  ;;  %v1749_v53 = vmul.f32 %v1745_v21, %v1736_v47 }
 0xf20   :  { %v1752_v54 = vmul.f32 %v1748_v52, %v1722_v49  ;;  %v1753_v56 = vmul.f32 %v1749_v53, %v1736_v47 }
 0xf21   :  { %v1723_v57 = vpop.f32.mrf.mxu0  ;;  %v1737_v58 = vpop.f32.mrf.mxu1 }
 0xf22   :  { %v1756_v59 = vadd.f32 %v1752_v54, %v1722_v49  ;;  %v1724_v60 = vadd.f32 %v1723_v57, %v1665_v45  ;;  %v1738_v61 = vadd.f32 %v1737_v58, %v1666_v46  ;;  %v1757_v62 = vadd.f32 %v1753_v56, %v1736_v47 }
 0xf24   :  { %v1746_v63 = vmul.f32 0.044715, %v1724_v60  ;;  %v1747_v0 = vmul.f32 0.044715, %v1738_v61  ;;  %v1760_v1 = vmul.f32 0.7978846, %v1756_v59 }
 0xf25   :  { %v1761_v4 = vmul.f32 0.7978846, %v1757_v62  ;;  %v1742_v22 = vmul.f32 0.5, %v1724_v60  ;;  %v1743_v25 = vmul.f32 0.5, %v1738_v61 }
 0xf26   :  { %v1750_v2 = vmul.f32 %v1746_v63, %v1724_v60  ;;  %v1751_v5 = vmul.f32 %v1747_v0, %v1738_v61  ;;  %2815 = vtanh.f32 %v1760_v1 }
 0xf27   :  { %2817 = vtanh.f32 %v1761_v4 }
 0xf28   :  { %v1754_v6 = vmul.f32 %v1750_v2, %v1724_v60  ;;  %v1755_v8 = vmul.f32 %v1751_v5, %v1738_v61 }
 0xf2a   :  { %v1758_v9 = vadd.f32 %v1754_v6, %v1724_v60  ;;  %v1759_v10 = vadd.f32 %v1755_v8, %v1738_v61  ;;  %v2720_v8 = vld [vmem:[%s3723_s16] ss:$0 sm:$0xff] }
 0xf2c   :  { %v1762_v11 = vmul.f32 0.7978846, %v1758_v9  ;;  %v1763_v12 = vmul.f32 0.7978846, %v1759_v10  ;;  %v2816_v13 = vpop.eup %2815 }
 0xf2d   :  { %v2818_v14 = vpop.eup %2817  ;;  %v1768_v15 = vadd.f32 1.0, %v2816_v13 }
 0xf2e   :  { %2819 = vtanh.f32 %v1762_v11  ;;  %v1769_v18 = vadd.f32 1.0, %v2818_v14 }
 0xf2f   :  { %2821 = vtanh.f32 %v1763_v12  ;;  %v1772_v32 = vmul.f32 %v1768_v15, %v1740_v20  ;;  %v2721_v12 = vld [vmem:[%s3724_s17] ss:$0 sm:$0xff] }
 0xf30   :  { %v1773_v37 = vmul.f32 %v1769_v18, %v1741_v55 }
 0xf34   :  { %v2820_v16 = vpop.eup %2819 }
 0xf35   :  { %v2822_v19 = vpop.eup %2821  ;;  %v1770_v24 = vadd.f32 1.0, %v2820_v16 }
 0xf36   :  { %v1771_v27 = vadd.f32 1.0, %v2822_v19 }
 0xf37   :  { %v1774_v28 = vmul.f32 %v1770_v24, %v1742_v22 }
 0xf38   :  { %v1775_v3 = vmul.f32 %v1771_v27, %v1743_v25 }
 0xf39   :  { %v1809_v51 = vpack.c.bf16 %v1774_v28, %v1772_v32 }
 0xf3a   :  { %v1810_v29 = vpack.c.bf16 %v1775_v3, %v1773_v37 }
 0xf3b   :  { %1915 = vmatmul.bf16.vlgmr.msrb.gmra.mxu2 %v1809_v51 }
 0xf3c   :  { %1929 = vmatmul.bf16.vlgmr.msra.gmra.mxu3 %v1810_v29 }
 0xfbe   :  { %v1916_v44 = vpop.f32.mrf.mxu2 }
 0xfbf   :  { %v1930_v30 = vpop.f32.mrf.mxu3 }
 0xfc0   :  { %v1931_v31 = vadd.f32 %v1930_v30, %v1916_v44 }
 0xfc2   :  { %v1935_v33 = vadd.f32 %v1931_v31, %v3527_v23  ;;  %v2668_v31 = vld [vmem:[%s3727_s20 + $0x18] sm:$0xff] }
 0xfc3   :  { %2092 = vmatpush.bf16.msra.mxu0 %v2668_v31 }
 0xfc4   :  { %v1942_v34 = vadd.f32 %v2719_v7, %v1935_v33  ;;  %v2666_v33 = vld [vmem:[%s3727_s20 + $0x8] sm:$0xff] }
 0xfc6   :  { %v1946_v35 = vsel %vm241_vm0, %v1942_v34, 0.0  ;;  %v1918_v36 = vpop.f32.mrf.mxu2 }
 0xfc7   :  { %v1932_v38 = vpop.f32.mrf.mxu3  ;;  %1947 = vadd.xlane.f32.xlu1 %v1946_v35 }
 0xfc8   :  { %v1933_v39 = vadd.f32 %v1932_v38, %v1918_v36 }
 0xfca   :  { %v1936_v41 = vadd.f32 %v1933_v39, %v3532_v26 }
 0xfcc   :  { %v1943_v42 = vadd.f32 %v2719_v7, %v1936_v41  ;;  %v2667_v7 = vld [vmem:[%s3727_s20 + $0x10] sm:$0xff] }
 0xfcd   :  { %2093 = vmatpush.bf16.msra.mxu0 %v2667_v7 }
 0xfce   :  { %v1949_v43 = vsel %vm241_vm0, %v1943_v42, 0.0 }
 0xfcf   :  { %1950 = vadd.xlane.f32.xlu0 %v1949_v43 }
 0xfd1   :  { %2094 = vmatpush.bf16.msra.mxu0 %v2666_v33 }
0x103a   :  { %v1948_v45 = vpop.xlane.xlu1 %1947 }
0x103b   :  { %v1952_v46 = vmul.f32 %v1948_v45, %v3055_v40 }
0x103d   :  { %v1954_v17 = vsub.f32 %v1942_v34, %v1952_v46  ;;  %v2665_v34 = vld [vmem:[%s3727_s20] sm:$0xff] }
0x103e   :  { %2095 = vmatpush.bf16.msra.mxu0 %v2665_v34 }
0x103f   :  { %v1956_v48 = vmul.f32 %v1954_v17, %v1954_v17 }
0x1041   :  { %v1958_v23 = vsel %vm241_vm0, %v1956_v48, 0.0 }
0x1042   :  { %1959 = vadd.xlane.f32.xlu0 %v1958_v23  ;;  %v1951_v49 = vpop.xlane.xlu0 %1950 }
0x1043   :  { %v1953_v47 = vmul.f32 %v1951_v49, %v3055_v40 }
0x1045   :  { %v1955_v50 = vsub.f32 %v1943_v42, %v1953_v47 }
0x1047   :  { %v1957_v21 = vmul.f32 %v1955_v50, %v1955_v50 }
0x1049   :  { %v1961_v52 = vsel %vm241_vm0, %v1957_v21, 0.0  ;;  %v2724_v21 = vld [vmem:[%s3728_s21] ss:$0 sm:$0xff] }
0x104a   :  { %1962 = vadd.xlane.f32.xlu2 %v1961_v52 }
0x10b5   :  { %v1960_v26 = vpop.xlane.xlu0 %1959 }
0x10b6   :  { %v1964_v53 = vmul.f32 %v1960_v26, %v3055_v40 }
0x10b8   :  { %v1966_v54 = vadd.f32 1e-06, %v1964_v53 }
0x10ba   :  { %2823 = vrsqrt.f32 %v1966_v54  ;;  %vm1974_vm15 = vweird.f32 %v1966_v54 }
0x10bd   :  { %v1963_v56 = vpop.xlane.xlu2 %1962 }
0x10be   :  { %v1965_v57 = vmul.f32 %v1963_v56, %v3055_v40 }
0x10c0   :  { %v2824_v58 = vpop.eup %2823  ;;  %v1967_v59 = vadd.f32 1e-06, %v1965_v57 }
0x10c1   :  { %v1969_v60 = vmul.f32 %v2824_v58, %v1966_v54  ;;  %vm1975_vm14 = vweird.f32 %v2824_v58 }
0x10c2   :  { %2825 = vrsqrt.f32 %v1967_v59  ;;  %vm1976_vm1 = vmor %vm1974_vm15, %vm1975_vm14  ;;  %vm1984_vm3 = vweird.f32 %v1967_v59 }
0x10c3   :  { %v1970_v61 = vmul.f32 %v2824_v58, %v1969_v60 }
0x10c5   :  { %v1971_v62 = vmul.f32 0.5, %v1970_v61 }
0x10c7   :  { %v1972_v63 = vsub.f32 1.5, %v1971_v62 }
0x10c8   :  { %v2826_v0 = vpop.eup %2825 }
0x10c9   :  { %v1973_v1 = vmul.f32 %v2824_v58, %v1972_v63  ;;  %v1979_v2 = vmul.f32 %v2826_v0, %v1967_v59  ;;  %vm1985_vm2 = vweird.f32 %v2826_v0 }
0x10ca   :  { %vm1986_vm4 = vmor %vm1984_vm3, %vm1985_vm2 }
0x10cb   :  { %v1977_v4 = vsel %vm1976_vm1, %v2824_v58, %v1973_v1  ;;  %v1980_v5 = vmul.f32 %v2826_v0, %v1979_v2 }
0x10cc   :  { %v1988_v6 = vmul.f32 %v1977_v4, %v1954_v17  ;;  %v2722_v17 = vld [vmem:[%s3725_s18] ss:$0 sm:$0xff] }
0x10cd   :  { %v1981_v9 = vmul.f32 0.5, %v1980_v5 }
0x10ce   :  { %v1993_v11 = vmul.f32 %v2720_v8, %v1988_v6 }
0x10cf   :  { %v1982_v10 = vsub.f32 1.5, %v1981_v9 }
0x10d0   :  { %v1998_v16 = vadd.f32 %v2721_v12, %v1993_v11 }
0x10d1   :  { %v1983_v13 = vmul.f32 %v2826_v0, %v1982_v10 }
0x10d2   :  { %v2001_v20 = vrot.slane %v1998_v16, 1 }
0x10d3   :  { %v1987_v14 = vsel %vm1986_vm4, %v2826_v0, %v1983_v13 }
0x10d4   :  { %v1989_v15 = vmul.f32 %v1987_v14, %v1955_v50  ;;  %v2003_v24 = vadd.f32 %v2001_v20, %v1998_v16 }
0x10d6   :  { %v1994_v18 = vmul.f32 %v2720_v8, %v1989_v15  ;;  %v2004_v27 = vmul.f32 0.5, %v2003_v24 }
0x10d8   :  { %v1999_v19 = vadd.f32 %v2721_v12, %v1994_v18 }
0x10da   :  { %v2006_v22 = vrot.slane %v1999_v19, 1 }
0x10dc   :  { %v2008_v55 = vadd.f32 %v2006_v22, %v1999_v19 }
0x10de   :  { %v2009_v25 = vmul.f32 0.5, %v2008_v55 }
0x10e0   :  { %v2011_v32 = vrot.slane %v2009_v25, 7 }
0x10e2   :  { %v2014_v28 = vsel %vm2013_vm5, %v2004_v27, %v2011_v32 }
0x10e3   :  { %v2018_v37 = vsel %vm2017_vm6, %v2014_v28, 0.0 }
0x10e4   :  { %2019 = vadd.xlane.f32.xlu1 %v2018_v37 }
0x1157   :  { %v2020_v3 = vpop.xlane.xlu1 %2019 }
0x1158   :  { %v2021_v51 = vmul.f32 %v2020_v3, %v3055_v40 }
0x115a   :  { %v2022_v29 = vsub.f32 %v2014_v28, %v2021_v51 }
0x115c   :  { %v2023_v44 = vmul.f32 %v2022_v29, %v2022_v29 }
0x115e   :  { %v2024_v30 = vsel %vm2017_vm6, %v2023_v44, 0.0 }
0x115f   :  { %2025 = vadd.xlane.f32.xlu2 %v2024_v30 }
0x11d2   :  { %v2026_v35 = vpop.xlane.xlu2 %2025 }
0x11d3   :  { %v2027_v36 = vmul.f32 %v2026_v35, %v3055_v40  ;;  %v2723_v40 = vld [vmem:[%s3726_s19] ss:$0 sm:$0xff] }
0x11d5   :  { %v2028_v38 = vadd.f32 1e-05, %v2027_v36 }
0x11d7   :  { %2827 = vrsqrt.f32 %v2028_v38  ;;  %vm2035_vm8 = vweird.f32 %v2028_v38 }
0x11dd   :  { %v2828_v39 = vpop.eup %2827 }
0x11de   :  { %v2030_v41 = vmul.f32 %v2828_v39, %v2028_v38  ;;  %vm2036_vm7 = vweird.f32 %v2828_v39 }
0x11df   :  { %vm2037_vm9 = vmor %vm2035_vm8, %vm2036_vm7 }
0x11e0   :  { %v2031_v42 = vmul.f32 %v2828_v39, %v2030_v41 }
0x11e2   :  { %v2032_v43 = vmul.f32 0.5, %v2031_v42 }
0x11e4   :  { %v2033_v45 = vsub.f32 1.5, %v2032_v43 }
0x11e6   :  { %v2034_v46 = vmul.f32 %v2828_v39, %v2033_v45 }
0x11e8   :  { %v2038_v48 = vsel %vm2037_vm9, %v2828_v39, %v2034_v46 }
0x11e9   :  { %v2039_v23 = vmul.f32 %v2038_v48, %v2022_v29 }
0x11eb   :  { %v2043_v49 = vmul.f32 %v2722_v17, %v2039_v23 }
0x11ed   :  { %v2047_v47 = vadd.f32 %v2723_v40, %v2043_v49 }
0x11ef   :  { %v2056_v50 = vpack.c.bf16 %v2047_v47, %v2047_v47 }
0x11f1   :  { %2576 = vmatmul.msk.bf16.vlgmr.msra.gmra.mxu0 %vm241_vm0, %v2056_v50 }
0x126e   :  { %v2097_v52 = vpop.f32.mrf.mxu0 }
0x126f   :  { %v2098_v26 = vadd.f32 %v2724_v21, %v2097_v52 }
0x1271   :  { %2101 = vst [vmem:[#allocation2] sm:$0x3] %v2098_v26 }
0x1272   :  { %2112 = dma.vmem_to_hbm [thread:$0]  %s2108_s6, 32, %s2110_s23, [#allocation3]  }
0x1276   :  { %v2099_v53 = vpop.f32.mrf.mxu0 }
0x1277   :  { %2855 = dma.done.wait [#allocation3], 32  }
0x1278   :  { %2856 = vsyncadd [#allocation3], 4294967264 }
0x1279   :  { %2117 = vsyncpa [#allocation3], 1 }

</bundles_post_ra>
